<compile_context>
chip_gen: v7x
topology: tpu7x:2x2x1
jax: 0.10.0
libtpu: 0.0.40
codegen_flags: <defaults>
</compile_context>

<pallas_src>
import jax
import jax.numpy as jnp
import numpy as np
from jax import lax
from jax.experimental import pallas as pl
from jax.experimental.pallas import tpu as pltpu

NUM_BLOCKS = 5
BN_EPS = 1e-3


def _make_kernel(num_blocks, k, pad, t_tile, halo, seq_len):
    w_in = t_tile + 2 * halo  # rows of the halo'd time window handed to the kernel

    def kernel(x_ref, *refs):
        o_ref = refs[-1]
        params = refs[:-1]
        t = pl.program_id(1)

        x0 = x_ref[0, 0]          # (w_in, c_in) f32 halo'd time window
        h = x0

        for i in range(num_blocks):
            dw = params[3 * i][...]       # (k, c_b)      f32 depthwise taps
            pw = params[3 * i + 1][...]   # (c_b, c_out)  bf16 pointwise (BN-folded)
            b = params[3 * i + 2][...]    # (1, c_out)    f32 BN-folded bias

            w_i = w_in - 2 * i * pad      # valid rows of h shrink by `pad` per
            w_o = w_i - 2 * pad           # side for every depthwise conv

            # Reproduce the reference's per-layer zero padding at the true
            # sequence boundary: rows whose global time index falls outside
            # [0, seq_len) must be zero before this layer's depthwise conv.
            # Row r of h corresponds to global time t*t_tile - halo + i*pad + r;
            # block 0's out-of-range rows are already zero from the wrapper pad.
            if i > 0:
                g = (t * t_tile - halo + i * pad
                     + lax.broadcasted_iota(jnp.int32, (w_i, 1), 0))
                h = jnp.where((g >= 0) & (g < seq_len), h, 0.0)

            # Depthwise conv along time: shifted static slices + VPU FMAs.
            acc = h[0:w_o, :] * dw[0:1, :]
            for j in range(1, k):
                acc = acc + h[j:j + w_o, :] * dw[j:j + 1, :]

            # Pointwise 1x1 conv (MXU, bf16 in / f32 accumulate) + folded BN.
            z = jnp.dot(acc.astype(jnp.bfloat16), pw,
                        preferred_element_type=jnp.float32) + b
            if i != num_blocks - 1:       # last ConvBlock has no ReLU
                z = jnp.maximum(z, 0.0)
            h = z                          # (w_o, c_out)

        # Residual branch on the central t_tile rows: 1x1 conv + folded BN.
        res_w = params[3 * num_blocks][...]       # (c_in, c_out) bf16
        res_b = params[3 * num_blocks + 1][...]   # (1, c_out)    f32
        xc = x0[halo:halo + t_tile, :]
        r = jnp.dot(xc.astype(jnp.bfloat16), res_w,
                    preferred_element_type=jnp.float32) + res_b

        # out = Dropout(ReLU(residual + blocks)); p = 0.0 -> identity.
        o_ref[0] = jnp.maximum(r + h, 0.0).astype(o_ref.dtype)

    return kernel


def jasper_block_pallas(x_btc, flat_params, *, c_out, k, pad, t_tile=None,
                        num_blocks=NUM_BLOCKS):
    B, T, c_in = x_btc.shape
    assert 2 * pad == k - 1, "residual add needs 'same' time length (2*pad == k-1)"
    halo = num_blocks * pad                        # cumulative receptive field

    if t_tile is None:
        t_tile = min(512, ((T + 7) // 8) * 8)
    assert t_tile % 8 == 0, "t_tile must be a multiple of 8 (f32 sublane)"
    n_t = (T + t_tile - 1) // t_tile
    w_in = t_tile + 2 * halo

    # Overlapping halo'd time windows (B, n_t, w_in, c_in), built once in the
    # wrapper so the standard BlockSpec pipeline double-buffers window loads
    # and both grid axes stay "parallel" (no cross-step state in the kernel).
    x_pad = jnp.pad(x_btc, ((0, 0), (halo, n_t * t_tile - T + halo), (0, 0)))
    starts = jnp.arange(n_t) * t_tile
    idx = starts[:, None] + jnp.arange(w_in)[None, :]   # (n_t, w_in)
    frames = x_pad[:, idx, :]                            # (B, n_t, w_in, c_in)

    kernel = _make_kernel(num_blocks, k, pad, t_tile, halo, T)

    in_specs = [pl.BlockSpec((1, 1, w_in, c_in), lambda b, t: (b, t, 0, 0))]
    # Parameters: full-array blocks with a constant index map.  Matmul weights
    # are stored bf16 to halve their VMEM footprint; for production channel
    # widths also consider single-buffering them or a one-shot DMA into scratch.
    in_specs += [pl.BlockSpec(p.shape, lambda b, t: (0, 0)) for p in flat_params]

    # Scoped-VMEM budget: double-buffered window + output tile + params, plus
    # headroom for in-kernel intermediates; clamped to a safe range.
    param_bytes = sum(int(p.size) * p.dtype.itemsize for p in flat_params)
    est = (2 * (w_in * c_in + t_tile * c_out) * 4 + 2 * param_bytes
           + 8 * w_in * max(c_in, c_out) * 4)
    vmem_limit = int(min(48 * 1024 * 1024, max(4 * est, 16 * 1024 * 1024)))

    out_full = pl.pallas_call(
        kernel,
        out_shape=jax.ShapeDtypeStruct((B, n_t * t_tile, c_out), jnp.float32),
        grid=(B, n_t),
        in_specs=in_specs,
        out_specs=pl.BlockSpec((1, t_tile, c_out), lambda b, t: (b, t, 0)),
        compiler_params=pltpu.CompilerParams(
            dimension_semantics=("parallel", "parallel"),
            vmem_limit_bytes=vmem_limit),
    )(frames, *flat_params)
    return out_full[:, :T, :]


def init_params(key, c_in, c_out, k, num_blocks=NUM_BLOCKS):
    """Deterministic parameters in PyTorch layout (Conv1d OIH, BN vectors)."""
    keys = iter(jax.random.split(key, num_blocks * 6 + 5))
    blocks = []
    for i in range(num_blocks):
        c_b = c_in if i == 0 else c_out
        dw = 0.3 * jax.random.normal(next(keys), (c_b, 1, k), jnp.float32)
        pw = 0.3 * jax.random.normal(next(keys), (c_out, c_b, 1), jnp.float32)
        gamma = 1.0 + 0.1 * jax.random.normal(next(keys), (c_out,), jnp.float32)
        beta = 0.1 * jax.random.normal(next(keys), (c_out,), jnp.float32)
        mean = 0.1 * jax.random.normal(next(keys), (c_out,), jnp.float32)
        var = jax.random.uniform(next(keys), (c_out,), jnp.float32,
                                 minval=0.5, maxval=1.5)
        blocks.append((dw, pw, gamma, beta, mean, var))
    rw = 0.3 * jax.random.normal(next(keys), (c_out, c_in, 1), jnp.float32)
    rgamma = 1.0 + 0.1 * jax.random.normal(next(keys), (c_out,), jnp.float32)
    rbeta = 0.1 * jax.random.normal(next(keys), (c_out,), jnp.float32)
    rmean = 0.1 * jax.random.normal(next(keys), (c_out,), jnp.float32)
    rvar = jax.random.uniform(next(keys), (c_out,), jnp.float32,
                              minval=0.5, maxval=1.5)
    return blocks, (rw, rgamma, rbeta, rmean, rvar)


def fold_params(blocks, res):
    """Fold eval-mode BatchNorm into pointwise conv weight + bias, put weights
    into the kernel's channels-last layout, and store matmul weights in bf16
    (MXU full-rate, half VMEM).  Depthwise taps and biases stay f32 (VPU path)."""
    flat = []
    for dw, pw, gamma, beta, mean, var in blocks:
        s = gamma / jnp.sqrt(var + BN_EPS)
        flat.append(jnp.transpose(dw[:, 0, :], (1, 0)))                     # (k, C_b) f32
        flat.append((jnp.transpose(pw[:, :, 0], (1, 0))
                     * s[None, :]).astype(jnp.bfloat16))                    # (C_b, C_out) bf16
        flat.append((beta - mean * s)[None, :])                             # (1, C_out) f32
    rw, rgamma, rbeta, rmean, rvar = res
    s = rgamma / jnp.sqrt(rvar + BN_EPS)
    flat.append((jnp.transpose(rw[:, :, 0], (1, 0))
                 * s[None, :]).astype(jnp.bfloat16))                        # (C_in, C_out) bf16
    flat.append((rbeta - rmean * s)[None, :])                               # (1, C_out) f32
    return flat


def reference_nct(x_nct, blocks, res, pad):
    """Pure-JAX f32 reference matching the PyTorch module (NCT layout, eval)."""
    def bn(h, gamma, beta, mean, var):
        inv = lax.rsqrt(var + BN_EPS)
        return ((gamma * inv)[None, :, None] * (h - mean[None, :, None])
                + beta[None, :, None])

    def conv1d(h, w, padding, groups=1):
        return lax.conv_general_dilated(
            h, w, window_strides=(1,), padding=[(padding, padding)],
            dimension_numbers=("NCH", "OIH", "NCH"),
            feature_group_count=groups)

    h = x_nct
    for i, (dw, pw, gamma, beta, mean, var) in enumerate(blocks):
        h = conv1d(h, dw, pad, groups=dw.shape[0])   # depthwise
        h = conv1d(h, pw, 0)                         # pointwise
        h = bn(h, gamma, beta, mean, var)
        if i != len(blocks) - 1:
            h = jnp.maximum(h, 0.0)
    rw, rgamma, rbeta, rmean, rvar = res
    r = bn(conv1d(x_nct, rw, 0), rgamma, rbeta, rmean, rvar)
    return jnp.maximum(r + h, 0.0)                   # Dropout(p=0) = identity


if __name__ == "__main__":
    # Small shapes; T is deliberately NOT a multiple of t_tile so the halo,
    # boundary-mask and crop paths are exercised.  2*PAD == K-1 keeps T fixed.
    B, C_IN, C_OUT, T, K, PAD = 2, 8, 16, 40, 5, 2
    T_TILE = 16

    key = jax.random.PRNGKey(0)
    kx, kp = jax.random.split(key)
    x_nct = jax.random.normal(kx, (B, C_IN, T), jnp.float32)  # PyTorch layout

    blocks, res = init_params(kp, C_IN, C_OUT, K)
    flat = fold_params(blocks, res)

    x_btc = jnp.transpose(x_nct, (0, 2, 1))          # kernel layout (B, T, C)
    out_btc = jasper_block_pallas(x_btc, flat, c_out=C_OUT, k=K, pad=PAD,
                                  t_tile=T_TILE)
    out_nct = jnp.transpose(out_btc, (0, 2, 1))
    jax.block_until_ready(out_nct)

    ref = reference_nct(x_nct, blocks, res, PAD)
    # bf16 matmul weights -> compare against the f32 reference loosely.
    np.testing.assert_allclose(np.asarray(out_nct), np.asarray(ref),
                               rtol=5e-2, atol=5e-2)

    # TODO(synk): SqueezeExcite path (include_se_block=True) and training-mode
    # BatchNorm / non-zero Dropout are not implemented (module defaults used).
    print("KERNEL_OK")
</pallas_src>

<mosaic_0001>
module attributes {stable_mosaic.version = 11 : i64} {
  func.func @kernel(%arg0: i32, %arg1: i32, %arg2: memref<1x1x36x8xf32, #tpu.memory_space<vmem>>, %arg3: memref<5x8xf32, #tpu.memory_space<vmem>>, %arg4: memref<8x16xbf16, #tpu.memory_space<vmem>>, %arg5: memref<1x16xf32, #tpu.memory_space<vmem>>, %arg6: memref<5x16xf32, #tpu.memory_space<vmem>>, %arg7: memref<16x16xbf16, #tpu.memory_space<vmem>>, %arg8: memref<1x16xf32, #tpu.memory_space<vmem>>, %arg9: memref<5x16xf32, #tpu.memory_space<vmem>>, %arg10: memref<16x16xbf16, #tpu.memory_space<vmem>>, %arg11: memref<1x16xf32, #tpu.memory_space<vmem>>, %arg12: memref<5x16xf32, #tpu.memory_space<vmem>>, %arg13: memref<16x16xbf16, #tpu.memory_space<vmem>>, %arg14: memref<1x16xf32, #tpu.memory_space<vmem>>, %arg15: memref<5x16xf32, #tpu.memory_space<vmem>>, %arg16: memref<16x16xbf16, #tpu.memory_space<vmem>>, %arg17: memref<1x16xf32, #tpu.memory_space<vmem>>, %arg18: memref<8x16xbf16, #tpu.memory_space<vmem>>, %arg19: memref<1x16xf32, #tpu.memory_space<vmem>>, %arg20: memref<1x16x16xf32, #tpu.memory_space<vmem>>) attributes {dimension_semantics = [#tpu.dimension_semantics<parallel>, #tpu.dimension_semantics<parallel>], iteration_bounds = array<i64: 2, 3>, scalar_prefetch = 0 : i64, scratch_operands = 0 : i64, tpu.core_type = #tpu.core_type<tc>, window_params = [{transform_indices = @transform_0, window_bounds = array<i64: 1, 1, 36, 8>}, {pipeline_mode = #tpu.pipeline_mode<synchronous>, transform_indices = @transform_1, window_bounds = array<i64: 5, 8>}, {pipeline_mode = #tpu.pipeline_mode<synchronous>, transform_indices = @transform_2, window_bounds = array<i64: 8, 16>}, {pipeline_mode = #tpu.pipeline_mode<synchronous>, transform_indices = @transform_3, window_bounds = array<i64: 1, 16>}, {pipeline_mode = #tpu.pipeline_mode<synchronous>, transform_indices = @transform_4, window_bounds = array<i64: 5, 16>}, {pipeline_mode = #tpu.pipeline_mode<synchronous>, transform_indices = @transform_5, window_bounds = array<i64: 16, 16>}, {pipeline_mode = #tpu.pipeline_mode<synchronous>, transform_indices = @transform_6, window_bounds = array<i64: 1, 16>}, {pipeline_mode = #tpu.pipeline_mode<synchronous>, transform_indices = @transform_7, window_bounds = array<i64: 5, 16>}, {pipeline_mode = #tpu.pipeline_mode<synchronous>, transform_indices = @transform_8, window_bounds = array<i64: 16, 16>}, {pipeline_mode = #tpu.pipeline_mode<synchronous>, transform_indices = @transform_9, window_bounds = array<i64: 1, 16>}, {pipeline_mode = #tpu.pipeline_mode<synchronous>, transform_indices = @transform_10, window_bounds = array<i64: 5, 16>}, {pipeline_mode = #tpu.pipeline_mode<synchronous>, transform_indices = @transform_11, window_bounds = array<i64: 16, 16>}, {pipeline_mode = #tpu.pipeline_mode<synchronous>, transform_indices = @transform_12, window_bounds = array<i64: 1, 16>}, {pipeline_mode = #tpu.pipeline_mode<synchronous>, transform_indices = @transform_13, window_bounds = array<i64: 5, 16>}, {pipeline_mode = #tpu.pipeline_mode<synchronous>, transform_indices = @transform_14, window_bounds = array<i64: 16, 16>}, {pipeline_mode = #tpu.pipeline_mode<synchronous>, transform_indices = @transform_15, window_bounds = array<i64: 1, 16>}, {pipeline_mode = #tpu.pipeline_mode<synchronous>, transform_indices = @transform_16, window_bounds = array<i64: 8, 16>}, {pipeline_mode = #tpu.pipeline_mode<synchronous>, transform_indices = @transform_17, window_bounds = array<i64: 1, 16>}, {transform_indices = @transform_18, window_bounds = array<i64: 1, 16, 16>}]} {
    %c0 = arith.constant 0 : index
    %c0_0 = arith.constant 0 : index
    %c0_1 = arith.constant 0 : index
    %c0_2 = arith.constant 0 : index
    %0 = vector.load %arg2[%c0, %c0_0, %c0_1, %c0_2] : memref<1x1x36x8xf32, #tpu.memory_space<vmem>>, vector<1x1x36x8xf32>
    %1 = vector.shape_cast %0 : vector<1x1x36x8xf32> to vector<36x8xf32>
    %c0_3 = arith.constant 0 : index
    %c0_4 = arith.constant 0 : index
    %2 = vector.load %arg3[%c0_3, %c0_4] : memref<5x8xf32, #tpu.memory_space<vmem>>, vector<5x8xf32>
    %c0_5 = arith.constant 0 : index
    %c0_6 = arith.constant 0 : index
    %3 = vector.load %arg4[%c0_5, %c0_6] : memref<8x16xbf16, #tpu.memory_space<vmem>>, vector<8x16xbf16>
    %c0_7 = arith.constant 0 : index
    %c0_8 = arith.constant 0 : index
    %4 = vector.load %arg5[%c0_7, %c0_8] : memref<1x16xf32, #tpu.memory_space<vmem>>, vector<1x16xf32>
    %5 = vector.extract_strided_slice %1 {offsets = [0, 0], sizes = [32, 8], strides = [1, 1]} : vector<36x8xf32> to vector<32x8xf32>
    %6 = vector.extract_strided_slice %2 {offsets = [0, 0], sizes = [1, 8], strides = [1, 1]} : vector<5x8xf32> to vector<1x8xf32>
    %7 = vector.broadcast %6 : vector<1x8xf32> to vector<32x8xf32>
    %8 = arith.mulf %5, %7 : vector<32x8xf32>
    %9 = vector.extract_strided_slice %1 {offsets = [1, 0], sizes = [32, 8], strides = [1, 1]} : vector<36x8xf32> to vector<32x8xf32>
    %10 = vector.extract_strided_slice %2 {offsets = [1, 0], sizes = [1, 8], strides = [1, 1]} : vector<5x8xf32> to vector<1x8xf32>
    %11 = vector.broadcast %10 : vector<1x8xf32> to vector<32x8xf32>
    %12 = arith.mulf %9, %11 : vector<32x8xf32>
    %13 = arith.addf %8, %12 : vector<32x8xf32>
    %14 = vector.extract_strided_slice %1 {offsets = [2, 0], sizes = [32, 8], strides = [1, 1]} : vector<36x8xf32> to vector<32x8xf32>
    %15 = vector.extract_strided_slice %2 {offsets = [2, 0], sizes = [1, 8], strides = [1, 1]} : vector<5x8xf32> to vector<1x8xf32>
    %16 = vector.broadcast %15 : vector<1x8xf32> to vector<32x8xf32>
    %17 = arith.mulf %14, %16 : vector<32x8xf32>
    %18 = arith.addf %13, %17 : vector<32x8xf32>
    %19 = vector.extract_strided_slice %1 {offsets = [3, 0], sizes = [32, 8], strides = [1, 1]} : vector<36x8xf32> to vector<32x8xf32>
    %20 = vector.extract_strided_slice %2 {offsets = [3, 0], sizes = [1, 8], strides = [1, 1]} : vector<5x8xf32> to vector<1x8xf32>
    %21 = vector.broadcast %20 : vector<1x8xf32> to vector<32x8xf32>
    %22 = arith.mulf %19, %21 : vector<32x8xf32>
    %23 = arith.addf %18, %22 : vector<32x8xf32>
    %24 = vector.extract_strided_slice %1 {offsets = [4, 0], sizes = [32, 8], strides = [1, 1]} : vector<36x8xf32> to vector<32x8xf32>
    %25 = vector.extract_strided_slice %2 {offsets = [4, 0], sizes = [1, 8], strides = [1, 1]} : vector<5x8xf32> to vector<1x8xf32>
    %26 = vector.broadcast %25 : vector<1x8xf32> to vector<32x8xf32>
    %27 = arith.mulf %24, %26 : vector<32x8xf32>
    %28 = arith.addf %23, %27 : vector<32x8xf32>
    %29 = arith.truncf %28 : vector<32x8xf32> to vector<32x8xbf16>
    %cst = arith.constant dense<0.000000e+00> : vector<32x16xf32>
    %30 = tpu.matmul %29, %3, %cst {dimension_numbers = #tpu.dot_dimension_numbers<[1], [0], [0], [1], [0, 0, 1, 1], [], []>} : vector<32x8xbf16>, vector<8x16xbf16>, vector<32x16xf32> -> vector<32x16xf32>
    %31 = vector.broadcast %4 : vector<1x16xf32> to vector<32x16xf32>
    %32 = arith.addf %30, %31 : vector<32x16xf32>
    %cst_9 = arith.constant 0.000000e+00 : f32
    %33 = vector.broadcast %cst_9 : f32 to vector<32x16xf32>
    %34 = arith.maximumf %32, %33 : vector<32x16xf32>
    %c0_10 = arith.constant 0 : index
    %c0_11 = arith.constant 0 : index
    %35 = vector.load %arg6[%c0_10, %c0_11] : memref<5x16xf32, #tpu.memory_space<vmem>>, vector<5x16xf32>
    %c0_12 = arith.constant 0 : index
    %c0_13 = arith.constant 0 : index
    %36 = vector.load %arg7[%c0_12, %c0_13] : memref<16x16xbf16, #tpu.memory_space<vmem>>, vector<16x16xbf16>
    %c0_14 = arith.constant 0 : index
    %c0_15 = arith.constant 0 : index
    %37 = vector.load %arg8[%c0_14, %c0_15] : memref<1x16xf32, #tpu.memory_space<vmem>>, vector<1x16xf32>
    %c16_i32 = arith.constant 16 : i32
    %38 = arith.muli %arg1, %c16_i32 : i32
    %c10_i32 = arith.constant 10 : i32
    %39 = arith.subi %38, %c10_i32 : i32
    %c2_i32 = arith.constant 2 : i32
    %40 = arith.addi %39, %c2_i32 : i32
    %41 = tpu.iota {dimensions = array<i32: 0>} : vector<32x1xi32>
    %42 = vector.broadcast %40 : i32 to vector<32x1xi32>
    %43 = arith.addi %42, %41 : vector<32x1xi32>
    %c0_i32 = arith.constant 0 : i32
    %44 = vector.broadcast %c0_i32 : i32 to vector<32x1xi32>
    %45 = arith.cmpi sge, %43, %44 : vector<32x1xi32>
    %c40_i32 = arith.constant 40 : i32
    %46 = vector.broadcast %c40_i32 : i32 to vector<32x1xi32>
    %47 = arith.cmpi slt, %43, %46 : vector<32x1xi32>
    %48 = arith.andi %45, %47 : vector<32x1xi1>
    %cst_16 = arith.constant 0.000000e+00 : f32
    %49 = vector.shape_cast %48 : vector<32x1xi1> to vector<32x1xi1>
    %50 = vector.broadcast %49 : vector<32x1xi1> to vector<32x16xi1>
    %51 = vector.broadcast %cst_16 : f32 to vector<32x16xf32>
    %52 = arith.select %50, %34, %51 : vector<32x16xi1>, vector<32x16xf32>
    %53 = vector.extract_strided_slice %52 {offsets = [0, 0], sizes = [28, 16], strides = [1, 1]} : vector<32x16xf32> to vector<28x16xf32>
    %54 = vector.extract_strided_slice %35 {offsets = [0, 0], sizes = [1, 16], strides = [1, 1]} : vector<5x16xf32> to vector<1x16xf32>
    %55 = vector.broadcast %54 : vector<1x16xf32> to vector<28x16xf32>
    %56 = arith.mulf %53, %55 : vector<28x16xf32>
    %57 = vector.extract_strided_slice %52 {offsets = [1, 0], sizes = [28, 16], strides = [1, 1]} : vector<32x16xf32> to vector<28x16xf32>
    %58 = vector.extract_strided_slice %35 {offsets = [1, 0], sizes = [1, 16], strides = [1, 1]} : vector<5x16xf32> to vector<1x16xf32>
    %59 = vector.broadcast %58 : vector<1x16xf32> to vector<28x16xf32>
    %60 = arith.mulf %57, %59 : vector<28x16xf32>
    %61 = arith.addf %56, %60 : vector<28x16xf32>
    %62 = vector.extract_strided_slice %52 {offsets = [2, 0], sizes = [28, 16], strides = [1, 1]} : vector<32x16xf32> to vector<28x16xf32>
    %63 = vector.extract_strided_slice %35 {offsets = [2, 0], sizes = [1, 16], strides = [1, 1]} : vector<5x16xf32> to vector<1x16xf32>
    %64 = vector.broadcast %63 : vector<1x16xf32> to vector<28x16xf32>
    %65 = arith.mulf %62, %64 : vector<28x16xf32>
    %66 = arith.addf %61, %65 : vector<28x16xf32>
    %67 = vector.extract_strided_slice %52 {offsets = [3, 0], sizes = [28, 16], strides = [1, 1]} : vector<32x16xf32> to vector<28x16xf32>
    %68 = vector.extract_strided_slice %35 {offsets = [3, 0], sizes = [1, 16], strides = [1, 1]} : vector<5x16xf32> to vector<1x16xf32>
    %69 = vector.broadcast %68 : vector<1x16xf32> to vector<28x16xf32>
    %70 = arith.mulf %67, %69 : vector<28x16xf32>
    %71 = arith.addf %66, %70 : vector<28x16xf32>
    %72 = vector.extract_strided_slice %52 {offsets = [4, 0], sizes = [28, 16], strides = [1, 1]} : vector<32x16xf32> to vector<28x16xf32>
    %73 = vector.extract_strided_slice %35 {offsets = [4, 0], sizes = [1, 16], strides = [1, 1]} : vector<5x16xf32> to vector<1x16xf32>
    %74 = vector.broadcast %73 : vector<1x16xf32> to vector<28x16xf32>
    %75 = arith.mulf %72, %74 : vector<28x16xf32>
    %76 = arith.addf %71, %75 : vector<28x16xf32>
    %77 = arith.truncf %76 : vector<28x16xf32> to vector<28x16xbf16>
    %cst_17 = arith.constant dense<0.000000e+00> : vector<28x16xf32>
    %78 = tpu.matmul %77, %36, %cst_17 {dimension_numbers = #tpu.dot_dimension_numbers<[1], [0], [0], [1], [0, 0, 1, 1], [], []>} : vector<28x16xbf16>, vector<16x16xbf16>, vector<28x16xf32> -> vector<28x16xf32>
    %79 = vector.broadcast %37 : vector<1x16xf32> to vector<28x16xf32>
    %80 = arith.addf %78, %79 : vector<28x16xf32>
    %cst_18 = arith.constant 0.000000e+00 : f32
    %81 = vector.broadcast %cst_18 : f32 to vector<28x16xf32>
    %82 = arith.maximumf %80, %81 : vector<28x16xf32>
    %c0_19 = arith.constant 0 : index
    %c0_20 = arith.constant 0 : index
    %83 = vector.load %arg9[%c0_19, %c0_20] : memref<5x16xf32, #tpu.memory_space<vmem>>, vector<5x16xf32>
    %c0_21 = arith.constant 0 : index
    %c0_22 = arith.constant 0 : index
    %84 = vector.load %arg10[%c0_21, %c0_22] : memref<16x16xbf16, #tpu.memory_space<vmem>>, vector<16x16xbf16>
    %c0_23 = arith.constant 0 : index
    %c0_24 = arith.constant 0 : index
    %85 = vector.load %arg11[%c0_23, %c0_24] : memref<1x16xf32, #tpu.memory_space<vmem>>, vector<1x16xf32>
    %c16_i32_25 = arith.constant 16 : i32
    %86 = arith.muli %arg1, %c16_i32_25 : i32
    %c10_i32_26 = arith.constant 10 : i32
    %87 = arith.subi %86, %c10_i32_26 : i32
    %c4_i32 = arith.constant 4 : i32
    %88 = arith.addi %87, %c4_i32 : i32
    %89 = tpu.iota {dimensions = array<i32: 0>} : vector<28x1xi32>
    %90 = vector.broadcast %88 : i32 to vector<28x1xi32>
    %91 = arith.addi %90, %89 : vector<28x1xi32>
    %c0_i32_27 = arith.constant 0 : i32
    %92 = vector.broadcast %c0_i32_27 : i32 to vector<28x1xi32>
    %93 = arith.cmpi sge, %91, %92 : vector<28x1xi32>
    %c40_i32_28 = arith.constant 40 : i32
    %94 = vector.broadcast %c40_i32_28 : i32 to vector<28x1xi32>
    %95 = arith.cmpi slt, %91, %94 : vector<28x1xi32>
    %96 = arith.andi %93, %95 : vector<28x1xi1>
    %cst_29 = arith.constant 0.000000e+00 : f32
    %97 = vector.shape_cast %96 : vector<28x1xi1> to vector<28x1xi1>
    %98 = vector.broadcast %97 : vector<28x1xi1> to vector<28x16xi1>
    %99 = vector.broadcast %cst_29 : f32 to vector<28x16xf32>
    %100 = arith.select %98, %82, %99 : vector<28x16xi1>, vector<28x16xf32>
    %101 = vector.extract_strided_slice %100 {offsets = [0, 0], sizes = [24, 16], strides = [1, 1]} : vector<28x16xf32> to vector<24x16xf32>
    %102 = vector.extract_strided_slice %83 {offsets = [0, 0], sizes = [1, 16], strides = [1, 1]} : vector<5x16xf32> to vector<1x16xf32>
    %103 = vector.broadcast %102 : vector<1x16xf32> to vector<24x16xf32>
    %104 = arith.mulf %101, %103 : vector<24x16xf32>
    %105 = vector.extract_strided_slice %100 {offsets = [1, 0], sizes = [24, 16], strides = [1, 1]} : vector<28x16xf32> to vector<24x16xf32>
    %106 = vector.extract_strided_slice %83 {offsets = [1, 0], sizes = [1, 16], strides = [1, 1]} : vector<5x16xf32> to vector<1x16xf32>
    %107 = vector.broadcast %106 : vector<1x16xf32> to vector<24x16xf32>
    %108 = arith.mulf %105, %107 : vector<24x16xf32>
    %109 = arith.addf %104, %108 : vector<24x16xf32>
    %110 = vector.extract_strided_slice %100 {offsets = [2, 0], sizes = [24, 16], strides = [1, 1]} : vector<28x16xf32> to vector<24x16xf32>
    %111 = vector.extract_strided_slice %83 {offsets = [2, 0], sizes = [1, 16], strides = [1, 1]} : vector<5x16xf32> to vector<1x16xf32>
    %112 = vector.broadcast %111 : vector<1x16xf32> to vector<24x16xf32>
    %113 = arith.mulf %110, %112 : vector<24x16xf32>
    %114 = arith.addf %109, %113 : vector<24x16xf32>
    %115 = vector.extract_strided_slice %100 {offsets = [3, 0], sizes = [24, 16], strides = [1, 1]} : vector<28x16xf32> to vector<24x16xf32>
    %116 = vector.extract_strided_slice %83 {offsets = [3, 0], sizes = [1, 16], strides = [1, 1]} : vector<5x16xf32> to vector<1x16xf32>
    %117 = vector.broadcast %116 : vector<1x16xf32> to vector<24x16xf32>
    %118 = arith.mulf %115, %117 : vector<24x16xf32>
    %119 = arith.addf %114, %118 : vector<24x16xf32>
    %120 = vector.extract_strided_slice %100 {offsets = [4, 0], sizes = [24, 16], strides = [1, 1]} : vector<28x16xf32> to vector<24x16xf32>
    %121 = vector.extract_strided_slice %83 {offsets = [4, 0], sizes = [1, 16], strides = [1, 1]} : vector<5x16xf32> to vector<1x16xf32>
    %122 = vector.broadcast %121 : vector<1x16xf32> to vector<24x16xf32>
    %123 = arith.mulf %120, %122 : vector<24x16xf32>
    %124 = arith.addf %119, %123 : vector<24x16xf32>
    %125 = arith.truncf %124 : vector<24x16xf32> to vector<24x16xbf16>
    %cst_30 = arith.constant dense<0.000000e+00> : vector<24x16xf32>
    %126 = tpu.matmul %125, %84, %cst_30 {dimension_numbers = #tpu.dot_dimension_numbers<[1], [0], [0], [1], [0, 0, 1, 1], [], []>} : vector<24x16xbf16>, vector<16x16xbf16>, vector<24x16xf32> -> vector<24x16xf32>
    %127 = vector.broadcast %85 : vector<1x16xf32> to vector<24x16xf32>
    %128 = arith.addf %126, %127 : vector<24x16xf32>
    %cst_31 = arith.constant 0.000000e+00 : f32
    %129 = vector.broadcast %cst_31 : f32 to vector<24x16xf32>
    %130 = arith.maximumf %128, %129 : vector<24x16xf32>
    %c0_32 = arith.constant 0 : index
    %c0_33 = arith.constant 0 : index
    %131 = vector.load %arg12[%c0_32, %c0_33] : memref<5x16xf32, #tpu.memory_space<vmem>>, vector<5x16xf32>
    %c0_34 = arith.constant 0 : index
    %c0_35 = arith.constant 0 : index
    %132 = vector.load %arg13[%c0_34, %c0_35] : memref<16x16xbf16, #tpu.memory_space<vmem>>, vector<16x16xbf16>
    %c0_36 = arith.constant 0 : index
    %c0_37 = arith.constant 0 : index
    %133 = vector.load %arg14[%c0_36, %c0_37] : memref<1x16xf32, #tpu.memory_space<vmem>>, vector<1x16xf32>
    %c16_i32_38 = arith.constant 16 : i32
    %134 = arith.muli %arg1, %c16_i32_38 : i32
    %c10_i32_39 = arith.constant 10 : i32
    %135 = arith.subi %134, %c10_i32_39 : i32
    %c6_i32 = arith.constant 6 : i32
    %136 = arith.addi %135, %c6_i32 : i32
    %137 = tpu.iota {dimensions = array<i32: 0>} : vector<24x1xi32>
    %138 = vector.broadcast %136 : i32 to vector<24x1xi32>
    %139 = arith.addi %138, %137 : vector<24x1xi32>
    %c0_i32_40 = arith.constant 0 : i32
    %140 = vector.broadcast %c0_i32_40 : i32 to vector<24x1xi32>
    %141 = arith.cmpi sge, %139, %140 : vector<24x1xi32>
    %c40_i32_41 = arith.constant 40 : i32
    %142 = vector.broadcast %c40_i32_41 : i32 to vector<24x1xi32>
    %143 = arith.cmpi slt, %139, %142 : vector<24x1xi32>
    %144 = arith.andi %141, %143 : vector<24x1xi1>
    %cst_42 = arith.constant 0.000000e+00 : f32
    %145 = vector.shape_cast %144 : vector<24x1xi1> to vector<24x1xi1>
    %146 = vector.broadcast %145 : vector<24x1xi1> to vector<24x16xi1>
    %147 = vector.broadcast %cst_42 : f32 to vector<24x16xf32>
    %148 = arith.select %146, %130, %147 : vector<24x16xi1>, vector<24x16xf32>
    %149 = vector.extract_strided_slice %148 {offsets = [0, 0], sizes = [20, 16], strides = [1, 1]} : vector<24x16xf32> to vector<20x16xf32>
    %150 = vector.extract_strided_slice %131 {offsets = [0, 0], sizes = [1, 16], strides = [1, 1]} : vector<5x16xf32> to vector<1x16xf32>
    %151 = vector.broadcast %150 : vector<1x16xf32> to vector<20x16xf32>
    %152 = arith.mulf %149, %151 : vector<20x16xf32>
    %153 = vector.extract_strided_slice %148 {offsets = [1, 0], sizes = [20, 16], strides = [1, 1]} : vector<24x16xf32> to vector<20x16xf32>
    %154 = vector.extract_strided_slice %131 {offsets = [1, 0], sizes = [1, 16], strides = [1, 1]} : vector<5x16xf32> to vector<1x16xf32>
    %155 = vector.broadcast %154 : vector<1x16xf32> to vector<20x16xf32>
    %156 = arith.mulf %153, %155 : vector<20x16xf32>
    %157 = arith.addf %152, %156 : vector<20x16xf32>
    %158 = vector.extract_strided_slice %148 {offsets = [2, 0], sizes = [20, 16], strides = [1, 1]} : vector<24x16xf32> to vector<20x16xf32>
    %159 = vector.extract_strided_slice %131 {offsets = [2, 0], sizes = [1, 16], strides = [1, 1]} : vector<5x16xf32> to vector<1x16xf32>
    %160 = vector.broadcast %159 : vector<1x16xf32> to vector<20x16xf32>
    %161 = arith.mulf %158, %160 : vector<20x16xf32>
    %162 = arith.addf %157, %161 : vector<20x16xf32>
    %163 = vector.extract_strided_slice %148 {offsets = [3, 0], sizes = [20, 16], strides = [1, 1]} : vector<24x16xf32> to vector<20x16xf32>
    %164 = vector.extract_strided_slice %131 {offsets = [3, 0], sizes = [1, 16], strides = [1, 1]} : vector<5x16xf32> to vector<1x16xf32>
    %165 = vector.broadcast %164 : vector<1x16xf32> to vector<20x16xf32>
    %166 = arith.mulf %163, %165 : vector<20x16xf32>
    %167 = arith.addf %162, %166 : vector<20x16xf32>
    %168 = vector.extract_strided_slice %148 {offsets = [4, 0], sizes = [20, 16], strides = [1, 1]} : vector<24x16xf32> to vector<20x16xf32>
    %169 = vector.extract_strided_slice %131 {offsets = [4, 0], sizes = [1, 16], strides = [1, 1]} : vector<5x16xf32> to vector<1x16xf32>
    %170 = vector.broadcast %169 : vector<1x16xf32> to vector<20x16xf32>
    %171 = arith.mulf %168, %170 : vector<20x16xf32>
    %172 = arith.addf %167, %171 : vector<20x16xf32>
    %173 = arith.truncf %172 : vector<20x16xf32> to vector<20x16xbf16>
    %cst_43 = arith.constant dense<0.000000e+00> : vector<20x16xf32>
    %174 = tpu.matmul %173, %132, %cst_43 {dimension_numbers = #tpu.dot_dimension_numbers<[1], [0], [0], [1], [0, 0, 1, 1], [], []>} : vector<20x16xbf16>, vector<16x16xbf16>, vector<20x16xf32> -> vector<20x16xf32>
    %175 = vector.broadcast %133 : vector<1x16xf32> to vector<20x16xf32>
    %176 = arith.addf %174, %175 : vector<20x16xf32>
    %cst_44 = arith.constant 0.000000e+00 : f32
    %177 = vector.broadcast %cst_44 : f32 to vector<20x16xf32>
    %178 = arith.maximumf %176, %177 : vector<20x16xf32>
    %c0_45 = arith.constant 0 : index
    %c0_46 = arith.constant 0 : index
    %179 = vector.load %arg15[%c0_45, %c0_46] : memref<5x16xf32, #tpu.memory_space<vmem>>, vector<5x16xf32>
    %c0_47 = arith.constant 0 : index
    %c0_48 = arith.constant 0 : index
    %180 = vector.load %arg16[%c0_47, %c0_48] : memref<16x16xbf16, #tpu.memory_space<vmem>>, vector<16x16xbf16>
    %c0_49 = arith.constant 0 : index
    %c0_50 = arith.constant 0 : index
    %181 = vector.load %arg17[%c0_49, %c0_50] : memref<1x16xf32, #tpu.memory_space<vmem>>, vector<1x16xf32>
    %c16_i32_51 = arith.constant 16 : i32
    %182 = arith.muli %arg1, %c16_i32_51 : i32
    %c10_i32_52 = arith.constant 10 : i32
    %183 = arith.subi %182, %c10_i32_52 : i32
    %c8_i32 = arith.constant 8 : i32
    %184 = arith.addi %183, %c8_i32 : i32
    %185 = tpu.iota {dimensions = array<i32: 0>} : vector<20x1xi32>
    %186 = vector.broadcast %184 : i32 to vector<20x1xi32>
    %187 = arith.addi %186, %185 : vector<20x1xi32>
    %c0_i32_53 = arith.constant 0 : i32
    %188 = vector.broadcast %c0_i32_53 : i32 to vector<20x1xi32>
    %189 = arith.cmpi sge, %187, %188 : vector<20x1xi32>
    %c40_i32_54 = arith.constant 40 : i32
    %190 = vector.broadcast %c40_i32_54 : i32 to vector<20x1xi32>
    %191 = arith.cmpi slt, %187, %190 : vector<20x1xi32>
    %192 = arith.andi %189, %191 : vector<20x1xi1>
    %cst_55 = arith.constant 0.000000e+00 : f32
    %193 = vector.shape_cast %192 : vector<20x1xi1> to vector<20x1xi1>
    %194 = vector.broadcast %193 : vector<20x1xi1> to vector<20x16xi1>
    %195 = vector.broadcast %cst_55 : f32 to vector<20x16xf32>
    %196 = arith.select %194, %178, %195 : vector<20x16xi1>, vector<20x16xf32>
    %197 = vector.extract_strided_slice %196 {offsets = [0, 0], sizes = [16, 16], strides = [1, 1]} : vector<20x16xf32> to vector<16x16xf32>
    %198 = vector.extract_strided_slice %179 {offsets = [0, 0], sizes = [1, 16], strides = [1, 1]} : vector<5x16xf32> to vector<1x16xf32>
    %199 = vector.broadcast %198 : vector<1x16xf32> to vector<16x16xf32>
    %200 = arith.mulf %197, %199 : vector<16x16xf32>
    %201 = vector.extract_strided_slice %196 {offsets = [1, 0], sizes = [16, 16], strides = [1, 1]} : vector<20x16xf32> to vector<16x16xf32>
    %202 = vector.extract_strided_slice %179 {offsets = [1, 0], sizes = [1, 16], strides = [1, 1]} : vector<5x16xf32> to vector<1x16xf32>
    %203 = vector.broadcast %202 : vector<1x16xf32> to vector<16x16xf32>
    %204 = arith.mulf %201, %203 : vector<16x16xf32>
    %205 = arith.addf %200, %204 : vector<16x16xf32>
    %206 = vector.extract_strided_slice %196 {offsets = [2, 0], sizes = [16, 16], strides = [1, 1]} : vector<20x16xf32> to vector<16x16xf32>
    %207 = vector.extract_strided_slice %179 {offsets = [2, 0], sizes = [1, 16], strides = [1, 1]} : vector<5x16xf32> to vector<1x16xf32>
    %208 = vector.broadcast %207 : vector<1x16xf32> to vector<16x16xf32>
    %209 = arith.mulf %206, %208 : vector<16x16xf32>
    %210 = arith.addf %205, %209 : vector<16x16xf32>
    %211 = vector.extract_strided_slice %196 {offsets = [3, 0], sizes = [16, 16], strides = [1, 1]} : vector<20x16xf32> to vector<16x16xf32>
    %212 = vector.extract_strided_slice %179 {offsets = [3, 0], sizes = [1, 16], strides = [1, 1]} : vector<5x16xf32> to vector<1x16xf32>
    %213 = vector.broadcast %212 : vector<1x16xf32> to vector<16x16xf32>
    %214 = arith.mulf %211, %213 : vector<16x16xf32>
    %215 = arith.addf %210, %214 : vector<16x16xf32>
    %216 = vector.extract_strided_slice %196 {offsets = [4, 0], sizes = [16, 16], strides = [1, 1]} : vector<20x16xf32> to vector<16x16xf32>
    %217 = vector.extract_strided_slice %179 {offsets = [4, 0], sizes = [1, 16], strides = [1, 1]} : vector<5x16xf32> to vector<1x16xf32>
    %218 = vector.broadcast %217 : vector<1x16xf32> to vector<16x16xf32>
    %219 = arith.mulf %216, %218 : vector<16x16xf32>
    %220 = arith.addf %215, %219 : vector<16x16xf32>
    %221 = arith.truncf %220 : vector<16x16xf32> to vector<16x16xbf16>
    %cst_56 = arith.constant dense<0.000000e+00> : vector<16x16xf32>
    %222 = tpu.matmul %221, %180, %cst_56 {dimension_numbers = #tpu.dot_dimension_numbers<[1], [0], [0], [1], [0, 0, 1, 1], [], []>} : vector<16x16xbf16>, vector<16x16xbf16>, vector<16x16xf32> -> vector<16x16xf32>
    %223 = vector.broadcast %181 : vector<1x16xf32> to vector<16x16xf32>
    %224 = arith.addf %222, %223 : vector<16x16xf32>
    %c0_57 = arith.constant 0 : index
    %c0_58 = arith.constant 0 : index
    %225 = vector.load %arg18[%c0_57, %c0_58] : memref<8x16xbf16, #tpu.memory_space<vmem>>, vector<8x16xbf16>
    %c0_59 = arith.constant 0 : index
    %c0_60 = arith.constant 0 : index
    %226 = vector.load %arg19[%c0_59, %c0_60] : memref<1x16xf32, #tpu.memory_space<vmem>>, vector<1x16xf32>
    %227 = vector.extract_strided_slice %1 {offsets = [10, 0], sizes = [16, 8], strides = [1, 1]} : vector<36x8xf32> to vector<16x8xf32>
    %228 = arith.truncf %227 : vector<16x8xf32> to vector<16x8xbf16>
    %cst_61 = arith.constant dense<0.000000e+00> : vector<16x16xf32>
    %229 = tpu.matmul %228, %225, %cst_61 {dimension_numbers = #tpu.dot_dimension_numbers<[1], [0], [0], [1], [0, 0, 1, 1], [], []>} : vector<16x8xbf16>, vector<8x16xbf16>, vector<16x16xf32> -> vector<16x16xf32>
    %230 = vector.broadcast %226 : vector<1x16xf32> to vector<16x16xf32>
    %231 = arith.addf %229, %230 : vector<16x16xf32>
    %232 = arith.addf %231, %224 : vector<16x16xf32>
    %cst_62 = arith.constant 0.000000e+00 : f32
    %233 = vector.broadcast %cst_62 : f32 to vector<16x16xf32>
    %234 = arith.maximumf %232, %233 : vector<16x16xf32>
    %c0_63 = arith.constant 0 : index
    %c0_64 = arith.constant 0 : index
    %c0_65 = arith.constant 0 : index
    %235 = vector.load %arg20[%c0_63, %c0_64, %c0_65] : memref<1x16x16xf32, #tpu.memory_space<vmem>>, vector<1x16x16xf32>
    %236 = vector.shape_cast %235 : vector<1x16x16xf32> to vector<16x16xf32>
    %237 = vector.shape_cast %234 : vector<16x16xf32> to vector<1x16x16xf32>
    tpu.vector_store %arg20[%c0_63, %c0_64, %c0_65], %237 {strides = array<i32>} : memref<1x16x16xf32, #tpu.memory_space<vmem>>, vector<1x16x16xf32>,
    return
  }
  func.func @transform_0(%arg0: i32, %arg1: i32) -> (i32, i32, i32, i32) {
    %c0_i32 = arith.constant 0 : i32
    %c0_i32_0 = arith.constant 0 : i32
    %c0_i32_1 = arith.constant 0 : i32
    return %arg0, %arg1, %c0_i32, %c0_i32_0 : i32, i32, i32, i32
  }
  func.func @transform_1(%arg0: i32, %arg1: i32) -> (i32, i32) {
    %c0_i32 = arith.constant 0 : i32
    %c0_i32_0 = arith.constant 0 : i32
    %c0_i32_1 = arith.constant 0 : i32
    return %c0_i32, %c0_i32_0 : i32, i32
  }
  func.func @transform_2(%arg0: i32, %arg1: i32) -> (i32, i32) {
    %c0_i32 = arith.constant 0 : i32
    %c0_i32_0 = arith.constant 0 : i32
    %c0_i32_1 = arith.constant 0 : i32
    return %c0_i32, %c0_i32_0 : i32, i32
  }
  func.func @transform_3(%arg0: i32, %arg1: i32) -> (i32, i32) {
    %c0_i32 = arith.constant 0 : i32
    %c0_i32_0 = arith.constant 0 : i32
    %c0_i32_1 = arith.constant 0 : i32
    return %c0_i32, %c0_i32_0 : i32, i32
  }
  func.func @transform_4(%arg0: i32, %arg1: i32) -> (i32, i32) {
    %c0_i32 = arith.constant 0 : i32
    %c0_i32_0 = arith.constant 0 : i32
    %c0_i32_1 = arith.constant 0 : i32
    return %c0_i32, %c0_i32_0 : i32, i32
  }
  func.func @transform_5(%arg0: i32, %arg1: i32) -> (i32, i32) {
    %c0_i32 = arith.constant 0 : i32
    %c0_i32_0 = arith.constant 0 : i32
    %c0_i32_1 = arith.constant 0 : i32
    return %c0_i32, %c0_i32_0 : i32, i32
  }
  func.func @transform_6(%arg0: i32, %arg1: i32) -> (i32, i32) {
    %c0_i32 = arith.constant 0 : i32
    %c0_i32_0 = arith.constant 0 : i32
    %c0_i32_1 = arith.constant 0 : i32
    return %c0_i32, %c0_i32_0 : i32, i32
  }
  func.func @transform_7(%arg0: i32, %arg1: i32) -> (i32, i32) {
    %c0_i32 = arith.constant 0 : i32
    %c0_i32_0 = arith.constant 0 : i32
    %c0_i32_1 = arith.constant 0 : i32
    return %c0_i32, %c0_i32_0 : i32, i32
  }
  func.func @transform_8(%arg0: i32, %arg1: i32) -> (i32, i32) {
    %c0_i32 = arith.constant 0 : i32
    %c0_i32_0 = arith.constant 0 : i32
    %c0_i32_1 = arith.constant 0 : i32
    return %c0_i32, %c0_i32_0 : i32, i32
  }
  func.func @transform_9(%arg0: i32, %arg1: i32) -> (i32, i32) {
    %c0_i32 = arith.constant 0 : i32
    %c0_i32_0 = arith.constant 0 : i32
    %c0_i32_1 = arith.constant 0 : i32
    return %c0_i32, %c0_i32_0 : i32, i32
  }
  func.func @transform_10(%arg0: i32, %arg1: i32) -> (i32, i32) {
    %c0_i32 = arith.constant 0 : i32
    %c0_i32_0 = arith.constant 0 : i32
    %c0_i32_1 = arith.constant 0 : i32
    return %c0_i32, %c0_i32_0 : i32, i32
  }
  func.func @transform_11(%arg0: i32, %arg1: i32) -> (i32, i32) {
    %c0_i32 = arith.constant 0 : i32
    %c0_i32_0 = arith.constant 0 : i32
    %c0_i32_1 = arith.constant 0 : i32
    return %c0_i32, %c0_i32_0 : i32, i32
  }
  func.func @transform_12(%arg0: i32, %arg1: i32) -> (i32, i32) {
    %c0_i32 = arith.constant 0 : i32
    %c0_i32_0 = arith.constant 0 : i32
    %c0_i32_1 = arith.constant 0 : i32
    return %c0_i32, %c0_i32_0 : i32, i32
  }
  func.func @transform_13(%arg0: i32, %arg1: i32) -> (i32, i32) {
    %c0_i32 = arith.constant 0 : i32
    %c0_i32_0 = arith.constant 0 : i32
    %c0_i32_1 = arith.constant 0 : i32
    return %c0_i32, %c0_i32_0 : i32, i32
  }
  func.func @transform_14(%arg0: i32, %arg1: i32) -> (i32, i32) {
    %c0_i32 = arith.constant 0 : i32
    %c0_i32_0 = arith.constant 0 : i32
    %c0_i32_1 = arith.constant 0 : i32
    return %c0_i32, %c0_i32_0 : i32, i32
  }
  func.func @transform_15(%arg0: i32, %arg1: i32) -> (i32, i32) {
    %c0_i32 = arith.constant 0 : i32
    %c0_i32_0 = arith.constant 0 : i32
    %c0_i32_1 = arith.constant 0 : i32
    return %c0_i32, %c0_i32_0 : i32, i32
  }
  func.func @transform_16(%arg0: i32, %arg1: i32) -> (i32, i32) {
    %c0_i32 = arith.constant 0 : i32
    %c0_i32_0 = arith.constant 0 : i32
    %c0_i32_1 = arith.constant 0 : i32
    return %c0_i32, %c0_i32_0 : i32, i32
  }
  func.func @transform_17(%arg0: i32, %arg1: i32) -> (i32, i32) {
    %c0_i32 = arith.constant 0 : i32
    %c0_i32_0 = arith.constant 0 : i32
    %c0_i32_1 = arith.constant 0 : i32
    return %c0_i32, %c0_i32_0 : i32, i32
  }
  func.func @transform_18(%arg0: i32, %arg1: i32) -> (i32, i32, i32) {
    %c0_i32 = arith.constant 0 : i32
    %c0_i32_0 = arith.constant 0 : i32
    return %arg0, %arg1, %c0_i32 : i32, i32, i32
  }
}

</mosaic_0001>

<bundles_post_ra>
// kernel: tpu_custom_call.1
= control target key start
LH: loop header
LB: loop body
LE: loop exit
PB: predicated region body
PF: predicated region fallthrough
CT: control target
= control target key end

     0   :  { %s2066_s27 = smov 0   ;;  %s2068_s28 = smov 0   ;;  %s2382_s0 = inlined_call_operand.vmem [shape: f32[2,3,36,8], index: 0, kind: input, shape index: {}]   ;;  %s2383_s1 = inlined_call_operand.vmem [shape: f32[5,8], index: 1, kind: input, shape index: {}]   ;;  %s2384_s2 = inlined_call_operand.vmem [shape: bf16[8,16], index: 2, kind: input, shape index: {}]   ;;  %s2385_s3 = inlined_call_operand.vmem [shape: f32[1,16], index: 3, kind: input, shape index: {}]   ;;  %s2386_s4 = inlined_call_operand.vmem [shape: f32[5,16], index: 4, kind: input, shape index: {}]   ;;  %s2387_s5 = inlined_call_operand.vmem [shape: bf16[16,16], index: 5, kind: input, shape index: {}]   ;;  %s2388_s6 = inlined_call_operand.vmem [shape: f32[1,16], index: 6, kind: input, shape index: {}]   ;;  %s2389_s7 = inlined_call_operand.vmem [shape: f32[5,16], index: 7, kind: input, shape index: {}]   ;;  %s2390_s8 = inlined_call_operand.vmem [shape: bf16[16,16], index: 8, kind: input, shape index: {}]   ;;  %s2391_s9 = inlined_call_operand.vmem [shape: f32[1,16], index: 9, kind: input, shape index: {}]   ;;  %s2392_s10 = inlined_call_operand.vmem [shape: f32[5,16], index: 10, kind: input, shape index: {}]   ;;  %s2393_s11 = inlined_call_operand.vmem [shape: bf16[16,16], index: 11, kind: input, shape index: {}]   ;;  %s2394_s12 = inlined_call_operand.vmem [shape: f32[1,16], index: 12, kind: input, shape index: {}]   ;;  %s2395_s13 = inlined_call_operand.vmem [shape: f32[5,16], index: 13, kind: input, shape index: {}]   ;;  %s2396_s14 = inlined_call_operand.vmem [shape: bf16[16,16], index: 14, kind: input, shape index: {}]   ;;  %s2397_s15 = inlined_call_operand.vmem [shape: f32[1,16], index: 15, kind: input, shape index: {}]   ;;  %s2398_s16 = inlined_call_operand.vmem [shape: bf16[8,16], index: 16, kind: input, shape index: {}]   ;;  %s2399_s17 = inlined_call_operand.vmem [shape: f32[1,16], index: 17, kind: input, shape index: {}]   ;;  %s2400_s18 = inlined_call_operand.vmem [shape: f32[2,48,16], index: 18, kind: output, shape index: {}]  }
   0x1   :  { %2401 = sst [smem:[#allocation3_spill]] %s2382_s0  ;;  %s2070_s29 = smov 0  }
   0x2   :  { %2402 = sst [smem:[#allocation4_spill]] %s2383_s1  ;;  %s2072_s30 = smov 0  }
   0x3   :  { %2403 = sst [smem:[#allocation5_spill]] %s2384_s2  ;;  %s2074_s0 = smov 0  }
   0x4   :  { %2404 = sst [smem:[#allocation6_spill]] %s2385_s3 }
   0x5 LB: > { %s37_s19 = sadd.s32 1, %s1959_s29  ;;  %s40_s1 = sadd.s32 1, %s1963_s30  ;;  %s1967_s0 = sphi %s2074_s0, %s28_s0   ;;  %s1963_s30 = sphi %s2072_s30, %s2414_s30   ;;  %s1959_s29 = sphi %s2070_s29, %s2413_s29   ;;  %s1955_s28 = sphi %s2068_s28, %s2412_s28   ;;  %s1951_s27 = sphi %s2066_s27, %s2411_s27  }
   0x6   : > { %p38_p0 = scmp.ge.s32.totalorder %s37_s19, 3  ;;  %p1792_p1 = scmp.ge.s32.totalorder %s1967_s0, 1 }
   0x7   : > { %p532_p2 = scmp.lt.s32.totalorder %s1967_s0, 7 }
   0x8   : > { %s2416_s19 = smov (%p38_p0, %s37_s19), 0  ;;  %s2418_s1 = smov (!%p38_p0, %s40_s1), %s1963_s30 }
   0x9   : > { %p533_p3 = pnand %p1792_p1, %p532_p2  ;;  %p42_p4 = scmp.ge.s32.totalorder %s2418_s1, 2 }
   0xa   : > { %s2406_s22 = sld [smem:[#allocation5_spill]] (!%p533_p3)  ;;  %vm740_vm0 = vcmask (!%p533_p3), 1043456   ;;  %p594_p5 = scmp.lt.s32.totalorder (!%p533_p3), %s1955_s28, 1  ;;  %v622_v1 = vlaneseq (!%p533_p3)  ;;  %vm644_vm1 = vcmask (!%p533_p3), 1046528   ;;  %vm676_vm2 = vcmask (!%p533_p3), 1045504  }
   0xb   : > { %s2420_s1 = smov (%p42_p4, %s2418_s1), 0  ;;  %536 = sbr.rel (%p533_p3) target bundleno = 1237 (0x4d5), region = 92 }
   0xc   : > { %2405 = sst [smem:[#allocation2_spill]] %s2420_s1  ;;  %p596_p6 = scmp.lt.s32.totalorder (!%p533_p3), %s1951_s27, 2  ;;  %v2106_v3 = vshrl.u32 (!%p533_p3), %v622_v1, 7  ;;  %vm708_vm3 = vcmask (!%p533_p3), 1044480   ;;  %vm766_vm4 = vcmask (!%p533_p3), 64512  }
   0xd   : > { %s2407_s26 = sld [smem:[#allocation4_spill]] (!%p533_p3)  ;;  %s2409_s3 = sld [smem:[#allocation6_spill]] (!%p533_p3) }
   0xe   : > { %v2114_v5 = vsub.s32 (!%p533_p3), 0, %v2106_v3  ;;  %v2117_v6 = vsub.s32 (!%p533_p3), 1, %v2106_v3  ;;  %v2120_v7 = vsub.s32 (!%p533_p3), 2, %v2106_v3  ;;  %v2123_v8 = vsub.s32 (!%p533_p3), 3, %v2106_v3  ;;  %s1794_s24 = sshll.u32 (!%p533_p3), %s1951_s27, 1 }
   0xf   : > { %v2126_v9 = vsub.s32 (!%p533_p3), 4, %v2106_v3  ;;  %p606_p7 = scmp.lt.s32.totalorder (!%p533_p3), %s1794_s24, 5 }
  0x10   : > { %v620_v0 = vld [vmem:[%s2406_s22] sm:$0xf] (!%p533_p3) }
  0x11   : > { %1879 = vmatprep.subr.msk.bf16.mxu1 (!%p533_p3), %vm740_vm0, %v620_v0  ;;  %v774_v2 = vsel (!%p533_p3), %vm740_vm0, %v620_v0, 0 }
  0x12   : > { %1836 = vmatpush3.bf16.msra.mxu1 %v774_v2  ;;  %s2422_s28 = smov (!%p594_p5, %s1955_s28), 1  ;;  %s2424_s24 = smov (!%p606_p7, %s1794_s24), 5 }
  0x13   : > { %s597_s2 = scalar_select %p596_p6, %s1951_s27, 2  ;;  %v619_v4 = vld [vmem:[%s2407_s26] sm:$0x1f] }
  0x14   : > { %s1881_s23 = smul.u32 15, %s2422_s28  ;;  %v625_v10 = vrot.slane %v619_v4, %v2114_v5  ;;  %v633_v11 = vrot.slane %v619_v4, %v2117_v6  ;;  %v665_v12 = vrot.slane %v619_v4, %v2120_v7  ;;  %s2408_s26 = sld [smem:[#allocation3_spill]]  ;;  %v2137_v13 = vrot.slane %v619_v4, %v2123_v8 }
  0x15   : > { %s1880_s20 = smul.u32 5, %s597_s2  ;;  %v2147_v17 = vrot.slane %v619_v4, %v2126_v9 }
  0x16   : > { %s1882_s25 = smul.u32 6, %s2422_s28 }
  0x17   : > { %s600_s21 = sadd.s32 %s1881_s23, %s1880_s20  ;;  %s2200_s23 = sshll.u32 %s1951_s27, 4 }
  0x18   : > { %s1793_s22 = sshll.u32 %s600_s21, 3  ;;  %s834_s20 = sadd.s32 4294967288, %s2200_s23 }
  0x19   : > { %s1063_s2 = sadd.s32 4294967290, %s2200_s23  ;;  %s609_s21 = sadd.s32 %s1882_s25, %s2424_s24 }
  0x1a   : > { %s2134_s1 = scalar_lea.vmem %s2408_s26, %s1793_s22  ;;  %s1464_s26 = sadd.s32 4294967294, %s2200_s23 }
  0x1b   : > { %v614_v14 = vld [vmem:[%s2134_s1] sm:$0xff]  ;;  %v2141_v15 = vld [vmem:[%s2134_s1 + $0x8] sm:$0xff]  ;;  %v2144_v16 = vld [vmem:[%s2134_s1 + $0x10] sm:$0xff] }
  0x1c   : > { %v626_v18 = vmul.f32 %v625_v10, %v614_v14  ;;  %v627_v19 = vmul.f32 %v625_v10, %v2141_v15  ;;  %v634_v20 = vmul.f32 %v633_v11, %v614_v14  ;;  %v635_v21 = vmul.f32 %v633_v11, %v2141_v15  ;;  %v2166_v46 = vld [vmem:[%s2134_s1 + $0x18] sm:$0xff]  ;;  %v618_v50 = vld [vmem:[%s2134_s1 + $0x20] sm:$0xf]  ;;  %s1275_s1 = sadd.s32 4294967292, %s2200_s23  ;;  %s1795_s23 = sshll.u32 %s609_s21, 3 }
  0x1d   : > { %v636_v22 = vmul.f32 %v633_v11, %v2144_v16  ;;  %v666_v23 = vmul.f32 %v665_v12, %v614_v14  ;;  %v667_v24 = vmul.f32 %v665_v12, %v2141_v15  ;;  %v668_v25 = vmul.f32 %v665_v12, %v2144_v16  ;;  %s611_s27 = scalar_lea.vmem %s2400_s18, %s1795_s23 }
  0x1e   : > { %v645_v26 = vrot.slane %v634_v20, 1  ;;  %v646_v27 = vrot.slane %v635_v21, 1  ;;  %v698_v28 = vmul.f32 %v2137_v13, %v614_v14  ;;  %v699_v29 = vmul.f32 %v2137_v13, %v2141_v15 }
  0x1f   : > { %v648_v30 = vrot.slane %v636_v22, 1  ;;  %v677_v31 = vrot.slane %v666_v23, 2  ;;  %v678_v32 = vrot.slane %v667_v24, 2  ;;  %v680_v33 = vrot.slane %v668_v25, 2 }
  0x20   : > { %v647_v34 = vsel %vm644_vm1, %v645_v26, %v646_v27  ;;  %v700_v35 = vmul.f32 %v2137_v13, %v2144_v16  ;;  %v709_v36 = vrot.slane %v698_v28, 3  ;;  %v710_v37 = vrot.slane %v699_v29, 3 }
  0x21   : > { %v649_v38 = vsel %vm644_vm1, %v646_v27, %v648_v30  ;;  %v658_v39 = vadd.f32 %v647_v34, %v626_v18  ;;  %v679_v40 = vsel %vm676_vm2, %v677_v31, %v678_v32  ;;  %v681_v41 = vsel %vm676_vm2, %v678_v32, %v680_v33 }
  0x22   : > { %v659_v42 = vadd.f32 %v649_v38, %v627_v19  ;;  %v711_v43 = vsel %vm708_vm3, %v709_v36, %v710_v37  ;;  %v712_v44 = vrot.slane %v700_v35, 3  ;;  %v730_v45 = vmul.f32 %v2147_v17, %v614_v14 }
  0x23   : > { %v690_v47 = vadd.f32 %v679_v40, %v658_v39  ;;  %v731_v48 = vmul.f32 %v2147_v17, %v2141_v15  ;;  %v732_v49 = vmul.f32 %v2147_v17, %v2144_v16  ;;  %v628_v51 = vmul.f32 %v625_v10, %v2144_v16 }
  0x24   : > { %v691_v52 = vadd.f32 %v681_v41, %v659_v42  ;;  %v713_v53 = vsel %vm708_vm3, %v710_v37, %v712_v44  ;;  %v741_v54 = vrot.slane %v730_v45, 4  ;;  %v629_v55 = vmul.f32 %v625_v10, %v2166_v46 }
  0x25   : > { %v722_v56 = vadd.f32 %v711_v43, %v690_v47  ;;  %v742_v57 = vrot.slane %v731_v48, 4  ;;  %v744_v58 = vrot.slane %v732_v49, 4  ;;  %v637_v59 = vmul.f32 %v633_v11, %v2166_v46 }
  0x26   : > { %v723_v60 = vadd.f32 %v713_v53, %v691_v52  ;;  %v638_v61 = vmul.f32 %v633_v11, %v618_v50  ;;  %v669_v62 = vmul.f32 %v665_v12, %v2166_v46  ;;  %v670_v63 = vmul.f32 %v665_v12, %v618_v50 }
  0x27   : > { %v743_v0 = vsel %vm740_vm0, %v741_v54, %v742_v57  ;;  %v745_v1 = vsel %vm740_vm0, %v742_v57, %v744_v58  ;;  %v650_v2 = vrot.slane %v637_v59, 1  ;;  %v701_v4 = vmul.f32 %v2137_v13, %v2166_v46 }
  0x28   : > { %v754_v14 = vadd.f32 %v743_v0, %v722_v56  ;;  %v755_v10 = vadd.f32 %v745_v1, %v723_v60  ;;  %v652_v18 = vrot.slane %v638_v61, 1  ;;  %v682_v19 = vrot.slane %v669_v62, 2 }
  0x29   : > { %v651_v20 = vsel %vm644_vm1, %v648_v30, %v650_v2  ;;  %v684_v21 = vrot.slane %v670_v63, 2  ;;  %v702_v11 = vmul.f32 %v2137_v13, %v618_v50  ;;  %v714_v22 = vrot.slane %v701_v4, 3 }
  0x2a   : > { %v758_v23 = vpack.c.bf16 %v755_v10, %v754_v14  ;;  %v653_v12 = vsel %vm644_vm1, %v650_v2, %v652_v18  ;;  %v660_v24 = vadd.f32 %v651_v20, %v628_v51  ;;  %v683_v25 = vsel %vm676_vm2, %v680_v33, %v682_v19  ;;  %v829_v51 = vld [vmem:[%s2386_s4] sm:$0x1f] }
  0x2b   : > { %v661_v26 = vadd.f32 %v653_v12, %v629_v55  ;;  %v685_v27 = vsel %vm676_vm2, %v682_v19, %v684_v21  ;;  %v715_v28 = vsel %vm708_vm3, %v712_v44, %v714_v22  ;;  %v716_v29 = vrot.slane %v702_v11, 3 }
  0x2c   : > { %1837 = vmatprep.mubr.msk.bf16.mxu1 %vm766_vm4, %v758_v23  ;;  %v692_v31 = vadd.f32 %v683_v25, %v660_v24  ;;  %v733_v30 = vmul.f32 %v2147_v17, %v2166_v46  ;;  %v734_v13 = vmul.f32 %v2147_v17, %v618_v50  ;;  %v1925_v17 = vld [vmem:[%s2387_s5] sm:$0xff]   ;;  %v2204_v43 = vadd.s32 16, %v2106_v3 }
  0x2d   : > { %v693_v32 = vadd.f32 %v685_v27, %v661_v26  ;;  %v717_v34 = vsel %vm708_vm3, %v714_v22, %v716_v29  ;;  %1841 = vmatprep.subr.bf16.mxu1 %v1925_v17  ;;  %v840_v44 = vstv %s834_s20  ;;  %v2207_v45 = vadd.s32 24, %v2106_v3  ;;  %v1796_v50 = vld [vmem:[%s2409_s3] ss:$0 sm:$0xff] }
  0x2e   : > { %v724_v35 = vadd.f32 %v715_v28, %v692_v31  ;;  %v746_v33 = vrot.slane %v733_v30, 4  ;;  %v748_v36 = vrot.slane %v734_v13, 4  ;;  %v843_v47 = vadd.s32 %v840_v44, %v2204_v43 }
  0x2f   : > { %v725_v37 = vadd.f32 %v717_v34, %v693_v32  ;;  %v841_v48 = vadd.s32 %v840_v44, %v2106_v3  ;;  %v844_v49 = vadd.s32 %v840_v44, %v2207_v45  ;;  %v2219_v52 = vadd.s32 8, %v2106_v3 }
  0x30   : > { %v747_v38 = vsel %vm740_vm0, %v744_v58, %v746_v33  ;;  %v749_v39 = vsel %vm740_vm0, %v746_v33, %v748_v36  ;;  %vm847_vm5 = vcmp.ge.s32.totalorder %v843_v47, 0  ;;  %vm851_vm6 = vcmp.lt.s32.totalorder %v843_v47, 40 }
  0x31   : > { %v756_v40 = vadd.f32 %v747_v38, %v724_v35  ;;  %v757_v41 = vadd.f32 %v749_v39, %v725_v37  ;;  %vm845_vm7 = vcmp.ge.s32.totalorder %v841_v48, 0  ;;  %vm849_vm8 = vcmp.lt.s32.totalorder %v841_v48, 40  ;;  %vm855_vm11 = vmand %vm847_vm5, %vm851_vm6 }
  0x32   : > { %v880_v55 = vrot.slane %v829_v51, %v2117_v6  ;;  %vm848_vm9 = vcmp.ge.s32.totalorder %v844_v49, 0  ;;  %vm852_vm10 = vcmp.lt.s32.totalorder %v844_v49, 40  ;;  %v907_v57 = vrot.slane %v829_v51, %v2120_v7  ;;  %vm853_vm12 = vmand %vm845_vm7, %vm849_vm8 }
  0x33   : > { %v759_v42 = vpack.c.bf16 %v757_v41, %v756_v40  ;;  %v934_v58 = vrot.slane %v829_v51, %v2123_v8  ;;  %v842_v61 = vadd.s32 %v840_v44, %v2219_v52  ;;  %v961_v63 = vrot.slane %v829_v51, %v2126_v9  ;;  %vm856_vm13 = vmand %vm848_vm9, %vm852_vm10 }
  0x34   : > { %v872_v2 = vrot.slane %v829_v51, %v2114_v5  ;;  %vm999_vm6 = vcmask 130048  }
  0x35   : > { %1838 = vmatmul.mubr.msk.bf16.vlgmr.msra.gmra.mrb[0].mxu1 %vm766_vm4, %v759_v42  ;;  %vm846_vm14 = vcmp.ge.s32.totalorder %v842_v61, 0  ;;  %vm850_vm15 = vcmp.lt.s32.totalorder %v842_v61, 40 }
  0x36   : > { %1842 = vmatpush3.bf16.msra.mxu1 %v1925_v17  ;;  %vm854_vm5 = vmand %vm846_vm14, %vm850_vm15 }
 0x108   : > { %v1839_v53 = vpop.f32.mrb[0].mxu1 }
 0x109   : > { %v819_v54 = vadd.f32 %v1839_v53, %v1796_v50  ;;  %v810_v56 = vpop.f32.mrb[1].mxu1 }
 0x10a   : > { %v811_v59 = vadd.f32 %v1796_v50, %v810_v56  ;;  %v1840_v60 = vpop.f32.mrb[2].mxu1 }
 0x10b   : > { %v827_v62 = vmax.f32 %v819_v54, 0.0  ;;  %v822_v0 = vadd.f32 %v1840_v60, %v1796_v50  ;;  %v813_v1 = vpop.f32.mrb[3].mxu1 }
 0x10c   : > { %v825_v4 = vmax.f32 %v811_v59, 0.0  ;;  %v814_v14 = vadd.f32 %v1796_v50, %v813_v1 }
 0x10d   : > { %v867_v10 = vsel %vm855_vm11, %v827_v62, 0.0  ;;  %v828_v18 = vmax.f32 %v822_v0, 0.0 }
 0x10e   : > { %v883_v19 = vmul.f32 %v880_v55, %v867_v10  ;;  %v910_v20 = vmul.f32 %v907_v57, %v867_v10  ;;  %v937_v21 = vmul.f32 %v934_v58, %v867_v10  ;;  %v2229_v11 = vmul.f32 %v961_v63, %v867_v10 }
 0x10f   : > { %v865_v22 = vsel %vm853_vm12, %v825_v4, 0.0  ;;  %v868_v23 = vsel %vm856_vm13, %v828_v18, 0.0  ;;  %v875_v12 = vmul.f32 %v872_v2, %v867_v10  ;;  %v826_v24 = vmax.f32 %v814_v14, 0.0 }
 0x110   : > { %v892_v25 = vrot.slane %v883_v19, 1  ;;  %v919_v26 = vrot.slane %v910_v20, 2  ;;  %v881_v27 = vmul.f32 %v880_v55, %v865_v22  ;;  %v908_v28 = vmul.f32 %v907_v57, %v865_v22 }
 0x111   : > { %v946_v29 = vrot.slane %v937_v21, 3  ;;  %v873_v31 = vmul.f32 %v872_v2, %v865_v22  ;;  %v884_v30 = vmul.f32 %v880_v55, %v868_v23  ;;  %v911_v13 = vmul.f32 %v907_v57, %v868_v23 }
 0x112   : > { %v973_v32 = vrot.slane %v2229_v11, 4  ;;  %v935_v34 = vmul.f32 %v934_v58, %v865_v22  ;;  %v962_v35 = vmul.f32 %v961_v63, %v865_v22  ;;  %v938_v33 = vmul.f32 %v934_v58, %v868_v23 }
 0x113   : > { %v876_v36 = vmul.f32 %v872_v2, %v868_v23  ;;  %v894_v37 = vrot.slane %v884_v30, 1  ;;  %v921_v38 = vrot.slane %v911_v13, 2  ;;  %v965_v39 = vmul.f32 %v961_v63, %v868_v23 }
 0x114   : > { %v889_v40 = vrot.slane %v881_v27, 1  ;;  %v916_v41 = vrot.slane %v908_v28, 2  ;;  %v948_v42 = vrot.slane %v938_v33, 3  ;;  %v866_v17 = vsel %vm854_vm5, %v826_v24, 0.0 }
 0x115   : > { %v895_v44 = vsel %vm644_vm1, %v892_v25, %v894_v37  ;;  %v903_v47 = vadd.f32 %v894_v37, %v876_v36  ;;  %v922_v48 = vsel %vm676_vm2, %v919_v26, %v921_v38  ;;  %v975_v49 = vrot.slane %v965_v39, 4  ;;  %v1800_v39 = vld [vmem:[%s2388_s6] ss:$0 sm:$0xff] }
 0x116   : > { %v943_v50 = vrot.slane %v935_v34, 3  ;;  %v902_v51 = vadd.f32 %v895_v44, %v875_v12  ;;  %v949_v53 = vsel %vm708_vm3, %v946_v29, %v948_v42  ;;  %v882_v54 = vmul.f32 %v880_v55, %v866_v17 }
 0x117   : > { %v930_v56 = vadd.f32 %v921_v38, %v903_v47  ;;  %v976_v59 = vsel %vm740_vm0, %v973_v32, %v975_v49  ;;  %v909_v60 = vmul.f32 %v907_v57, %v866_v17  ;;  %v936_v61 = vmul.f32 %v934_v58, %v866_v17 }
 0x118   : > { %v970_v62 = vrot.slane %v962_v35, 4  ;;  %v929_v0 = vadd.f32 %v922_v48, %v902_v51  ;;  %v890_v1 = vrot.slane %v882_v54, 1  ;;  %v963_v4 = vmul.f32 %v961_v63, %v866_v17 }
 0x119   : > { %v957_v14 = vadd.f32 %v948_v42, %v930_v56  ;;  %v874_v10 = vmul.f32 %v872_v2, %v866_v17  ;;  %v917_v18 = vrot.slane %v909_v60, 2  ;;  %v944_v19 = vrot.slane %v936_v61, 3 }
 0x11a   : > { %v956_v20 = vadd.f32 %v949_v53, %v929_v0  ;;  %v891_v21 = vsel %vm644_vm1, %v889_v40, %v890_v1  ;;  %v893_v11 = vsel %vm644_vm1, %v890_v1, %v892_v25  ;;  %v971_v22 = vrot.slane %v963_v4, 4  ;;  %v1059_v40 = vld [vmem:[%s2389_s7] sm:$0x1f] }
 0x11b   : > { %v984_v55 = vadd.f32 %v975_v49, %v957_v14  ;;  %v900_v23 = vadd.f32 %v891_v21, %v873_v31  ;;  %v901_v12 = vadd.f32 %v893_v11, %v874_v10  ;;  %v918_v57 = vsel %vm676_vm2, %v916_v41, %v917_v18 }
 0x11c   : > { %v920_v58 = vsel %vm676_vm2, %v917_v18, %v919_v26  ;;  %v945_v24 = vsel %vm708_vm3, %v943_v50, %v944_v19  ;;  %v947_v63 = vsel %vm708_vm3, %v944_v19, %v946_v29  ;;  %v972_v2 = vsel %vm740_vm0, %v970_v62, %v971_v22  ;;  %v1926_v26 = vld [vmem:[%s2390_s8] sm:$0xff]  }
 0x11d   : > { %v928_v27 = vadd.f32 %v920_v58, %v901_v12  ;;  %v927_v28 = vadd.f32 %v918_v57, %v900_v23  ;;  %v974_v30 = vsel %vm740_vm0, %v971_v22, %v973_v32  ;;  %v983_v25 = vadd.f32 %v976_v59, %v956_v20  ;;  %1847 = vmatprep.subr.bf16.mxu0 %v1926_v26 }
 0x11e   : > { %1848 = vmatpush3.bf16.msra.mxu0 %v1926_v26  ;;  %v1064_v29 = vstv %s1063_s2  ;;  %v1128_v47 = vrot.slane %v1059_v40, %v2120_v7  ;;  %v1153_v48 = vrot.slane %v1059_v40, %v2123_v8  ;;  %v1096_v53 = vrot.slane %v1059_v40, %v2114_v5 }
 0x11f   : > { %v954_v13 = vadd.f32 %v945_v24, %v927_v28  ;;  %v955_v34 = vadd.f32 %v947_v63, %v928_v27  ;;  %v986_v31 = vpack.c.bf16 %v984_v55, %v983_v25  ;;  %v1067_v32 = vadd.s32 %v1064_v29, %v2204_v43 }
 0x120   : > { %v1065_v37 = vadd.s32 %v1064_v29, %v2106_v3  ;;  %v1068_v38 = vadd.s32 %v1064_v29, %v2207_v45  ;;  %v1066_v44 = vadd.s32 %v1064_v29, %v2219_v52  ;;  %v1103_v45 = vrot.slane %v1059_v40, %v2117_v6 }
 0x121   : > { %v981_v35 = vadd.f32 %v972_v2, %v954_v13  ;;  %v982_v33 = vadd.f32 %v974_v30, %v955_v34  ;;  %vm1071_vm7 = vcmp.ge.s32.totalorder %v1067_v32, 0  ;;  %vm1075_vm8 = vcmp.lt.s32.totalorder %v1067_v32, 40 }
 0x122   : > { %vm1069_vm9 = vcmp.ge.s32.totalorder %v1065_v37, 0  ;;  %vm1073_vm10 = vcmp.lt.s32.totalorder %v1065_v37, 40  ;;  %vm1072_vm11 = vcmp.ge.s32.totalorder %v1068_v38, 0  ;;  %vm1076_vm12 = vcmp.lt.s32.totalorder %v1068_v38, 40  ;;  %vm1079_vm13 = vmand %vm1071_vm7, %vm1075_vm8 }
 0x123   : > { %v985_v36 = vpack.c.bf16 %v982_v33, %v981_v35  ;;  %vm1077_vm14 = vmand %vm1069_vm9, %vm1073_vm10  ;;  %v1178_v59 = vrot.slane %v1059_v40, %v2126_v9  ;;  %vm1070_vm5 = vcmp.ge.s32.totalorder %v1066_v44, 0  ;;  %vm1074_vm7 = vcmp.lt.s32.totalorder %v1066_v44, 40 }
 0x124   : > { %vm1080_vm15 = vmand %vm1072_vm11, %vm1076_vm12 }
 0x125   : > { %1843 = vmatprep.mubr.msk.bf16.mxu1 %vm999_vm6, %v985_v36  ;;  %vm1078_vm8 = vmand %vm1070_vm5, %vm1074_vm7 }
 0x126   : > { %1844 = vmatmul.mubr.msk.bf16.vlgmr.msra.gmra.mrb[4].mxu1 %vm999_vm6, %v986_v31 }
 0x1f9   : > { %v1845_v41 = vpop.f32.mrb[4].mxu1 }
 0x1fa   : > { %v1049_v42 = vadd.f32 %v1845_v41, %v1800_v39  ;;  %v1040_v17 = vpop.f32.mrb[5].mxu1 }
 0x1fb   : > { %v1041_v49 = vadd.f32 %v1800_v39, %v1040_v17  ;;  %v1846_v50 = vpop.f32.mrb[6].mxu1 }
 0x1fc   : > { %v1057_v51 = vmax.f32 %v1049_v42, 0.0  ;;  %v1052_v54 = vadd.f32 %v1846_v50, %v1800_v39  ;;  %v1043_v56 = vpop.f32.mrb[7].mxu1 }
 0x1fd   : > { %v1055_v60 = vmax.f32 %v1041_v49, 0.0  ;;  %v1044_v61 = vadd.f32 %v1800_v39, %v1043_v56 }
 0x1fe   : > { %v1091_v62 = vsel %vm1079_vm13, %v1057_v51, 0.0  ;;  %v1058_v0 = vmax.f32 %v1052_v54, 0.0 }
 0x1ff   : > { %v1106_v1 = vmul.f32 %v1103_v45, %v1091_v62  ;;  %v1131_v4 = vmul.f32 %v1128_v47, %v1091_v62  ;;  %v1156_v14 = vmul.f32 %v1153_v48, %v1091_v62  ;;  %v1099_v10 = vmul.f32 %v1096_v53, %v1091_v62 }
 0x200   : > { %v1089_v18 = vsel %vm1077_vm14, %v1055_v60, 0.0  ;;  %v1092_v19 = vsel %vm1080_vm15, %v1058_v0, 0.0  ;;  %v1056_v20 = vmax.f32 %v1044_v61, 0.0  ;;  %v1181_v55 = vmul.f32 %v1178_v59, %v1091_v62 }
 0x201   : > { %v1115_v21 = vrot.slane %v1106_v1, 1  ;;  %v1140_v11 = vrot.slane %v1131_v4, 2  ;;  %v1165_v22 = vrot.slane %v1156_v14, 3  ;;  %v1097_v23 = vmul.f32 %v1096_v53, %v1089_v18 }
 0x202   : > { %v1104_v12 = vmul.f32 %v1103_v45, %v1089_v18  ;;  %v1129_v57 = vmul.f32 %v1128_v47, %v1089_v18  ;;  %v1154_v58 = vmul.f32 %v1153_v48, %v1089_v18  ;;  %v1107_v24 = vmul.f32 %v1103_v45, %v1092_v19 }
 0x203   : > { %v1132_v63 = vmul.f32 %v1128_v47, %v1092_v19  ;;  %v1157_v2 = vmul.f32 %v1153_v48, %v1092_v19  ;;  %v1182_v27 = vmul.f32 %v1178_v59, %v1092_v19  ;;  %v1179_v25 = vmul.f32 %v1178_v59, %v1089_v18 }
 0x204   : > { %v1112_v28 = vrot.slane %v1104_v12, 1  ;;  %v1137_v30 = vrot.slane %v1129_v57, 2  ;;  %v1090_v13 = vsel %vm1078_vm8, %v1056_v20, 0.0  ;;  %v1162_v34 = vrot.slane %v1154_v58, 3 }
 0x205   : > { %v1117_v31 = vrot.slane %v1107_v24, 1  ;;  %v1142_v35 = vrot.slane %v1132_v63, 2  ;;  %v1167_v33 = vrot.slane %v1157_v2, 3  ;;  %v1192_v36 = vrot.slane %v1182_v27, 4  ;;  %v1804_v63 = vld [vmem:[%s2391_s9] ss:$0 sm:$0xff] }
 0x206   : > { %v1105_v26 = vmul.f32 %v1103_v45, %v1090_v13  ;;  %v1130_v29 = vmul.f32 %v1128_v47, %v1090_v13  ;;  %v1155_v32 = vmul.f32 %v1153_v48, %v1090_v13  ;;  %v1098_v39 = vmul.f32 %v1096_v53, %v1090_v13  ;;  %v1271_v2 = vld [vmem:[%s2392_s10] sm:$0x1f] }
 0x207   : > { %v1118_v37 = vsel %vm644_vm1, %v1115_v21, %v1117_v31  ;;  %v1143_v38 = vsel %vm676_vm2, %v1140_v11, %v1142_v35  ;;  %v1180_v40 = vmul.f32 %v1178_v59, %v1090_v13  ;;  %v1187_v49 = vrot.slane %v1179_v25, 4 }
 0x208   : > { %v1124_v41 = vadd.f32 %v1118_v37, %v1099_v10  ;;  %v1113_v42 = vrot.slane %v1105_v26, 1  ;;  %v1138_v17 = vrot.slane %v1130_v29, 2  ;;  %v1163_v44 = vrot.slane %v1155_v32, 3 }
 0x209   : > { %v1188_v50 = vrot.slane %v1180_v40, 4  ;;  %v1190_v51 = vrot.slane %v1181_v55, 4  ;;  %v1168_v54 = vsel %vm708_vm3, %v1165_v22, %v1167_v33  ;;  %v1276_v57 = vstv %s1275_s1 }
 0x20a   : > { %v1114_v56 = vsel %vm644_vm1, %v1112_v28, %v1113_v42  ;;  %v1116_v45 = vsel %vm644_vm1, %v1113_v42, %v1115_v21  ;;  %v1139_v47 = vsel %vm676_vm2, %v1137_v30, %v1138_v17  ;;  %v1141_v48 = vsel %vm676_vm2, %v1138_v17, %v1140_v11 }
 0x20b   : > { %v1122_v60 = vadd.f32 %v1114_v56, %v1097_v23  ;;  %v1123_v53 = vadd.f32 %v1116_v45, %v1098_v39  ;;  %v1164_v59 = vsel %vm708_vm3, %v1162_v34, %v1163_v44  ;;  %v1166_v61 = vsel %vm708_vm3, %v1163_v44, %v1165_v22  ;;  %v1927_v22 = vld [vmem:[%s2393_s11] sm:$0xff]  }
 0x20c   : > { %v1189_v62 = vsel %vm740_vm0, %v1187_v49, %v1188_v50  ;;  %v1191_v0 = vsel %vm740_vm0, %v1188_v50, %v1190_v51  ;;  %v1149_v1 = vadd.f32 %v1143_v38, %v1124_v41  ;;  %v1193_v4 = vsel %vm740_vm0, %v1190_v51, %v1192_v36  ;;  %1853 = vmatprep.subr.bf16.mxu1 %v1927_v22 }
 0x20d   : > { %v1147_v14 = vadd.f32 %v1139_v47, %v1122_v60  ;;  %v1148_v10 = vadd.f32 %v1141_v48, %v1123_v53  ;;  %1854 = vmatpush3.bf16.msra.mxu1 %v1927_v22  ;;  %v1279_v58 = vadd.s32 %v1276_v57, %v2204_v43  ;;  %v1277_v24 = vadd.s32 %v1276_v57, %v2106_v3 }
 0x20e   : > { %v1174_v18 = vadd.f32 %v1168_v54, %v1149_v1  ;;  %v1278_v28 = vadd.s32 %v1276_v57, %v2219_v52  ;;  %v1308_v13 = vrot.slane %v1271_v2, %v2117_v6  ;;  %v1301_v33 = vrot.slane %v1271_v2, %v2114_v5 }
 0x20f   : > { %v1172_v19 = vadd.f32 %v1164_v59, %v1147_v14  ;;  %v1173_v20 = vadd.f32 %v1166_v61, %v1148_v10  ;;  %vm1282_vm9 = vcmp.ge.s32.totalorder %v1279_v58, 0  ;;  %vm1285_vm10 = vcmp.lt.s32.totalorder %v1279_v58, 40 }
 0x210   : > { %v1199_v21 = vadd.f32 %v1193_v4, %v1174_v18  ;;  %vm1280_vm11 = vcmp.ge.s32.totalorder %v1277_v24, 0  ;;  %vm1283_vm12 = vcmp.lt.s32.totalorder %v1277_v24, 40  ;;  %vm1288_vm13 = vmand %vm1282_vm9, %vm1285_vm10  ;;  %v1329_v36 = vrot.slane %v1271_v2, %v2120_v7 }
 0x211   : > { %v1197_v11 = vadd.f32 %v1189_v62, %v1172_v19  ;;  %v1198_v55 = vadd.f32 %v1191_v0, %v1173_v20  ;;  %v1350_v26 = vrot.slane %v1271_v2, %v2123_v8  ;;  %vm1286_vm14 = vmand %vm1280_vm11, %vm1283_vm12  ;;  %vm1281_vm15 = vcmp.ge.s32.totalorder %v1278_v28, 0 }
 0x212   : > { %v1201_v12 = vpack.c.bf16 %v1199_v21, %v1199_v21  ;;  %vm1284_vm5 = vcmp.lt.s32.totalorder %v1278_v28, 40  ;;  %v1371_v39 = vrot.slane %v1271_v2, %v2126_v9  ;;  %vm1970_vm8 = vmmov 0  }
 0x213   : > { %v1200_v23 = vpack.c.bf16 %v1198_v55, %v1197_v11  ;;  %vm1287_vm7 = vmand %vm1281_vm15, %vm1284_vm5 }
 0x215   : > { %1849 = vmatprep.mubr.msk.bf16.mxu0 %vm999_vm6, %v1200_v23 }
 0x216   : > { %1850 = vmatmul.mubr.msk.bf16.vlgmr.msra.gmra.mrb[0].mxu0 %vm999_vm6, %v1201_v12 }
 0x2e9   : > { %v1851_v27 = vpop.f32.mrb[0].mxu0 }
 0x2ea   : > { %v1263_v30 = vadd.f32 %v1851_v27, %v1804_v63  ;;  %v1254_v25 = vpop.f32.mrb[1].mxu0 }
 0x2eb   : > { %v1255_v34 = vadd.f32 %v1804_v63, %v1254_v25  ;;  %v1852_v31 = vpop.f32.mrb[2].mxu0 }
 0x2ec   : > { %v1270_v35 = vmax.f32 %v1263_v30, 0.0  ;;  %v1257_v29 = vpop.f32.mrb[3].mxu0 }
 0x2ed   : > { %v1268_v32 = vmax.f32 %v1255_v34, 0.0  ;;  %v1258_v37 = vadd.f32 %v1804_v63, %v1257_v29 }
 0x2ee   : > { %v1297_v38 = vsel %vm1288_vm13, %v1270_v35, 0.0 }
 0x2ef   : > { %v1311_v40 = vmul.f32 %v1308_v13, %v1297_v38  ;;  %v1332_v41 = vmul.f32 %v1329_v36, %v1297_v38  ;;  %v1353_v42 = vmul.f32 %v1350_v26, %v1297_v38  ;;  %v1295_v17 = vsel %vm1286_vm14, %v1268_v32, 0.0 }
 0x2f0   : > { %v1269_v44 = vmax.f32 %v1258_v37, 0.0  ;;  %v1304_v49 = vmul.f32 %v1301_v33, %v1297_v38  ;;  %v1374_v51 = vmul.f32 %v1371_v39, %v1297_v38  ;;  %v1309_v54 = vmul.f32 %v1308_v13, %v1295_v17 }
 0x2f1   : > { %v1318_v50 = vrot.slane %v1311_v40, 1  ;;  %v1330_v45 = vmul.f32 %v1329_v36, %v1295_v17  ;;  %v1339_v48 = vrot.slane %v1332_v41, 2  ;;  %v1360_v60 = vrot.slane %v1353_v42, 3 }
 0x2f2   : > { %v1296_v47 = vsel %vm1287_vm7, %v1269_v44, 0.0  ;;  %v1351_v53 = vmul.f32 %v1350_v26, %v1295_v17  ;;  %v1302_v59 = vmul.f32 %v1301_v33, %v1295_v17  ;;  %v1372_v61 = vmul.f32 %v1371_v39, %v1295_v17  ;;  %v1808_v44 = vld [vmem:[%s2394_s12] ss:$0 sm:$0xff] }
 0x2f3   : > { %v1325_v56 = vadd.f32 %v1318_v50, %v1304_v49  ;;  %v1310_v62 = vmul.f32 %v1308_v13, %v1296_v47  ;;  %v1331_v0 = vmul.f32 %v1329_v36, %v1296_v47  ;;  %v1381_v1 = vrot.slane %v1374_v51, 4 }
 0x2f4   : > { %v1315_v4 = vrot.slane %v1309_v54, 1  ;;  %v1352_v14 = vmul.f32 %v1350_v26, %v1296_v47  ;;  %v1373_v10 = vmul.f32 %v1371_v39, %v1296_v47  ;;  %v1336_v19 = vrot.slane %v1330_v45, 2  ;;  %v1928_v39 = vld [vmem:[%s2396_s14] sm:$0xff]  }
 0x2f5   : > { %v1346_v18 = vadd.f32 %v1339_v48, %v1325_v56  ;;  %v1316_v20 = vrot.slane %v1310_v62, 1  ;;  %v1337_v21 = vrot.slane %v1331_v0, 2  ;;  %v1357_v11 = vrot.slane %v1351_v53, 3 }
 0x2f6   : > { %v1303_v55 = vmul.f32 %v1301_v33, %v1296_v47  ;;  %v1358_v23 = vrot.slane %v1352_v14, 3  ;;  %v1379_v12 = vrot.slane %v1373_v10, 4  ;;  %v1378_v22 = vrot.slane %v1372_v61, 4 }
 0x2f7   : > { %v1317_v57 = vsel %vm644_vm1, %v1315_v4, %v1316_v20  ;;  %v1319_v58 = vsel %vm644_vm1, %v1316_v20, %v1318_v50  ;;  %v1338_v24 = vsel %vm676_vm2, %v1336_v19, %v1337_v21  ;;  %v1340_v27 = vsel %vm676_vm2, %v1337_v21, %v1339_v48  ;;  %v1460_v50 = vld [vmem:[%s2395_s13] sm:$0x1f] }
 0x2f8   : > { %v1323_v63 = vadd.f32 %v1317_v57, %v1302_v59  ;;  %v1324_v2 = vadd.f32 %v1319_v58, %v1303_v55  ;;  %v1359_v28 = vsel %vm708_vm3, %v1357_v11, %v1358_v23  ;;  %v1367_v30 = vadd.f32 %v1360_v60, %v1346_v18 }
 0x2f9   : > { %v1361_v25 = vsel %vm708_vm3, %v1358_v23, %v1360_v60  ;;  %v1380_v13 = vsel %vm740_vm0, %v1378_v22, %v1379_v12  ;;  %v1382_v34 = vsel %vm740_vm0, %v1379_v12, %v1381_v1  ;;  %v1969_v40 = vmov 0.0  }
 0x2fa   : > { %v1345_v31 = vadd.f32 %v1340_v27, %v1324_v2  ;;  %v1344_v35 = vadd.f32 %v1338_v24, %v1323_v63  ;;  %v1388_v26 = vadd.f32 %v1381_v1, %v1367_v30  ;;  %1859 = vmatprep.subr.bf16.mxu0 %v1969_v40  ;;  %1861 = vmatprep.mubr.msk.bf16.mxu0 %vm1970_vm8, %v1969_v40  ;;  %v1465_v41 = vstv %s1464_s26 }
 0x2fb   : > { %1860 = vmatpush3.bf16.msra.mxu0 %v1928_v39  ;;  %v1468_v42 = vadd.s32 %v1465_v41, %v2204_v43  ;;  %v1466_v17 = vadd.s32 %v1465_v41, %v2106_v3  ;;  %v1467_v51 = vadd.s32 %v1465_v41, %v2219_v52  ;;  %v1496_v47 = vrot.slane %v1460_v50, %v2117_v6 }
 0x2fc   : > { %v1365_v33 = vadd.f32 %v1359_v28, %v1344_v35  ;;  %v1366_v36 = vadd.f32 %v1361_v25, %v1345_v31  ;;  %v1390_v38 = vpack.c.bf16 %v1388_v26, %v1388_v26  ;;  %1865 = vmatprep.subr.bf16.mxu0 %v1969_v40  ;;  %v1515_v48 = vrot.slane %v1460_v50, %v2120_v7 }
 0x2fd   : > { %vm1471_vm9 = vcmp.ge.s32.totalorder %v1468_v42, 0  ;;  %vm1474_vm10 = vcmp.lt.s32.totalorder %v1468_v42, 40  ;;  %vm1469_vm11 = vcmp.ge.s32.totalorder %v1466_v17, 0  ;;  %vm1472_vm12 = vcmp.lt.s32.totalorder %v1466_v17, 40 }
 0x2fe   : > { %v1386_v29 = vadd.f32 %v1380_v13, %v1365_v33  ;;  %v1387_v32 = vadd.f32 %v1382_v34, %v1366_v36  ;;  %vm1477_vm13 = vmand %vm1471_vm9, %vm1474_vm10  ;;  %v1534_v60 = vrot.slane %v1460_v50, %v2123_v8  ;;  %vm1470_vm15 = vcmp.ge.s32.totalorder %v1467_v51, 0 }
 0x2ff   : > { %vm1475_vm14 = vmand %vm1469_vm11, %vm1472_vm12  ;;  %vm1473_vm5 = vcmp.lt.s32.totalorder %v1467_v51, 40  ;;  %v1553_v62 = vrot.slane %v1460_v50, %v2126_v9  ;;  %v1490_v7 = vrot.slane %v1460_v50, %v2114_v5 }
 0x300   : > { %v1389_v37 = vpack.c.bf16 %v1387_v32, %v1386_v29  ;;  %vm1476_vm7 = vmand %vm1470_vm15, %vm1473_vm5 }
 0x302   : > { %1855 = vmatprep.mubr.msk.bf16.mxu1 %vm999_vm6, %v1389_v37 }
 0x303   : > { %1856 = vmatmul.mubr.msk.bf16.vlgmr.msra.gmra.mrb[8].mxu1 %vm999_vm6, %v1390_v38 }
 0x3d6   : > { %v1857_v49 = vpop.f32.mrb[8].mxu1 }
 0x3d7   : > { %v1452_v54 = vadd.f32 %v1857_v49, %v1808_v44  ;;  %v1443_v56 = vpop.f32.mrb[9].mxu1  ;;  %v1626_v49 = vld [vmem:[%s2398_s16] sm:$0xf] }
 0x3d8   : > { %v1444_v43 = vadd.f32 %v1808_v44, %v1443_v56  ;;  %v1858_v3 = vpop.f32.mrb[10].mxu1  ;;  %v1646_v56 = vsel %vm740_vm0, %v1626_v49, 0 }
 0x3d9   : > { %v1459_v45 = vmax.f32 %v1452_v54, 0.0  ;;  %v1446_v53 = vpop.f32.mrb[11].mxu1  ;;  %v1629_v3 = vpack.c.bf16 %v2166_v46, %v2166_v46 }
 0x3da   : > { %v1457_v59 = vmax.f32 %v1444_v43, 0.0  ;;  %v1447_v61 = vadd.f32 %v1808_v44, %v1446_v53  ;;  %v1628_v43 = vpack.c.bf16 %v2144_v16, %v2141_v15  ;;  %v1815_v15 = vld [vmem:[%s2399_s17] ss:$0 sm:$0xff] }
 0x3db   : > { %v1486_v52 = vsel %vm1477_vm13, %v1459_v45, 0.0 }
 0x3dc   : > { %v1499_v0 = vmul.f32 %v1496_v47, %v1486_v52  ;;  %v1518_v1 = vmul.f32 %v1515_v48, %v1486_v52  ;;  %v1484_v4 = vsel %vm1475_vm14, %v1457_v59, 0.0  ;;  %v1458_v14 = vmax.f32 %v1447_v61, 0.0 }
 0x3dd   : > { %v1537_v10 = vmul.f32 %v1534_v60, %v1486_v52  ;;  %v1556_v6 = vmul.f32 %v1553_v62, %v1486_v52  ;;  %v1497_v18 = vmul.f32 %v1496_v47, %v1484_v4  ;;  %v1516_v8 = vmul.f32 %v1515_v48, %v1484_v4 }
 0x3de   : > { %v1485_v19 = vsel %vm1476_vm7, %v1458_v14, 0.0  ;;  %v1506_v20 = vrot.slane %v1499_v0, 1  ;;  %v1525_v21 = vrot.slane %v1518_v1, 2  ;;  %v1535_v11 = vmul.f32 %v1534_v60, %v1484_v4 }
 0x3df   : > { %v1554_v55 = vmul.f32 %v1553_v62, %v1484_v4  ;;  %v1544_v23 = vrot.slane %v1537_v10, 3  ;;  %v1498_v12 = vmul.f32 %v1496_v47, %v1485_v19  ;;  %v1517_v22 = vmul.f32 %v1515_v48, %v1485_v19 }
 0x3e0   : > { %v1536_v9 = vmul.f32 %v1534_v60, %v1485_v19  ;;  %v1563_v57 = vrot.slane %v1556_v6, 4  ;;  %v1491_v58 = vmul.f32 %v1490_v7, %v1484_v4  ;;  %v1503_v24 = vrot.slane %v1497_v18, 1 }
 0x3e1   : > { %v1555_v63 = vmul.f32 %v1553_v62, %v1485_v19  ;;  %v1522_v2 = vrot.slane %v1516_v8, 2  ;;  %v1504_v27 = vrot.slane %v1498_v12, 1  ;;  %v1523_v28 = vrot.slane %v1517_v22, 2 }
 0x3e2   : > { %v1542_v30 = vrot.slane %v1536_v9, 3  ;;  %v1541_v5 = vrot.slane %v1535_v11, 3  ;;  %v1560_v25 = vrot.slane %v1554_v55, 4  ;;  %v1492_v13 = vmul.f32 %v1490_v7, %v1485_v19 }
 0x3e3   : > { %v1561_v34 = vrot.slane %v1555_v63, 4  ;;  %v1505_v31 = vsel %vm644_vm1, %v1503_v24, %v1504_v27  ;;  %v1507_v35 = vsel %vm644_vm1, %v1504_v27, %v1506_v20  ;;  %v1524_v33 = vsel %vm676_vm2, %v1522_v2, %v1523_v28 }
 0x3e4   : > { %v1526_v36 = vsel %vm676_vm2, %v1523_v28, %v1525_v21  ;;  %v1510_v26 = vadd.f32 %v1505_v31, %v1491_v58  ;;  %v1511_v29 = vadd.f32 %v1507_v35, %v1492_v13  ;;  %v1543_v32 = vsel %vm708_vm3, %v1541_v5, %v1542_v30 }
 0x3e5   : > { %v1545_v37 = vsel %vm708_vm3, %v1542_v30, %v1544_v23  ;;  %v1562_v38 = vsel %vm740_vm0, %v1560_v25, %v1561_v34  ;;  %v1564_v39 = vsel %vm740_vm0, %v1561_v34, %v1563_v57  ;;  %v1639_v45 = vrot.slane %v1628_v43, 1 }
 0x3e6   : > { %v1529_v41 = vadd.f32 %v1524_v33, %v1510_v26  ;;  %v1530_v42 = vadd.f32 %v1526_v36, %v1511_v29  ;;  %v1640_v47 = vrot.slane %v1629_v3, 1 }
 0x3e8   : > { %v1548_v17 = vadd.f32 %v1543_v32, %v1529_v41  ;;  %v1549_v44 = vadd.f32 %v1545_v37, %v1530_v42  ;;  %v1641_v48 = vsel %vm644_vm1, %v1639_v45, %v1640_v47 }
 0x3ea   : > { %v1567_v50 = vadd.f32 %v1562_v38, %v1548_v17  ;;  %v1568_v51 = vadd.f32 %v1564_v39, %v1549_v44 }
 0x3ec   : > { %v1569_v54 = vpack.c.bf16 %v1568_v51, %v1567_v50 }
 0x3ee   : > { %1862 = vmatmul.mubr.msk.bf16.vlgmr.msra.gmra.mrb[4].mxu0 %vm999_vm6, %v1569_v54 }
 0x3ef   : > { %1866 = vmatpush3.bf16.msra.mxu0 %v1646_v56  ;;  %1867 = vmatprep.mubr.msk.bf16.mxu0 %vm1970_vm8, %v1969_v40  ;;  %v1812_v40 = vld [vmem:[%s2397_s15] ss:$0 sm:$0xff] }
 0x3f0   : > { %v1871_v16 = vadd.f32 %v1815_v15, %v1812_v40 }
 0x3fa   : > { %1868 = vmatmul.mubr.msk.bf16.vlgmr.msra.gmra.mrb[4].mxu0 %vm766_vm4, %v1641_v48 }
 0x4cd   : > { %v1682_v46 = vpop.f32.mrb[4].mxu0 }
 0x4ce   : > { %v1872_v60 = vadd.f32 %v1871_v16, %v1682_v46  ;;  %v1869_v53 = vpop.f32.mrb[5].mxu0 }
 0x4cf   : > { %v1685_v59 = vpop.f32.mrb[6].mxu0 }
 0x4d0   : > { %v1691_v61 = vmax.f32 %v1872_v60, 0.0  ;;  %v1874_v52 = vadd.f32 %v1871_v16, %v1685_v59  ;;  %v1870_v62 = vpop.f32.mrb[7].mxu0 }
 0x4d2   : > { %1693 = vst.msk [vmem:[%s611_s27] sm:$0xff] %vm999_vm6, %v1691_v61  ;;  %v1692_v0 = vmax.f32 %v1874_v52, 0.0 }
 0x4d4   : > { %1694 = vst.msk [vmem:[%s611_s27 + $0x8] sm:$0xff] %vm999_vm6, %v1692_v0 }
 0x4d5 PF: > { %s28_s0 = sadd.s32 1, %s1967_s0   ;;  %s2410_s24 = sld [smem:[#allocation2_spill]] }
 0x4d6   : > { %p25_p8 = scmp.ge.s32.totalorder %s28_s0, 8   ;;  %s2411_s27 = smov %s1959_s29 }
 0x4d7   : > { %s2412_s28 = smov %s1963_s30  ;;  %s2413_s29 = smov %s2416_s19 }
 0x4d8   :  { %27 = sbr.rel (!%p25_p8) target bundleno = 5 (0x5), region = 122 }
 0x4db   : > { %s2414_s30 = smov %s2410_s24 }

</bundles_post_ra>
